<compile_context>
chip_gen: v6e
topology: v6e:2x2x1
jax: 0.10.0
libtpu: 0.0.40
codegen_flags: <defaults>
</compile_context>

<pallas_src>
import jax
import jax.numpy as jnp
from jax.experimental import pallas as pl
from jax.experimental.pallas import tpu as pltpu


def _round_up(x, m):
    return (x + m - 1) // m * m


def _padded_dims(C, A):
    cin_p = _round_up(C, 8)            # conv K dim        -> sublane multiple
    chid_p = _round_up(C, 128)         # hidden dim        -> lane multiple
    cout = 5 * A                       # fused [cls | bbox] channels
    cout_sub = _round_up(cout, 8)      # output sublanes (transposed store)
    cout_lane = _round_up(cout, 128)   # head matmul N dim -> lane multiple
    return cin_p, chid_p, cout, cout_sub, cout_lane


def _choose_tile_h(H, W):
    """Row-band height: an even divisor of H with a lane-dense (multiple of
    128) output band, capped so bands + activations stay well inside scoped
    VMEM on every TPU generation (including v7x's 64 MiB)."""
    cands = [th for th in range(2, H + 1, 2)
             if H % th == 0 and (th * W) % 128 == 0]
    if not cands:
        # TODO(synk): support odd / awkward H via a padded last band.
        return H
    good = [th for th in cands if th * W <= 4096]
    return max(good) if good else min(cands)


def _rpn_head_kernel(body_ref, tail_ref, wconv_ref, bconv_ref,
                     whead_ref, bhead_ref, out_ref, band_ref):
    # body_ref:  (1, TH, W+2, CIN)    band rows of the zero-padded NHWC image
    # tail_ref:  (1, 2,  W+2, CIN)    the 2 halo rows just below the band
    # wconv_ref: (9, CIN, CHID)       3x3 conv taps, channel-padded, bf16
    # bconv_ref: (1, CHID)            conv bias, f32
    # whead_ref: (CHID, COUT_LANE)    fused [cls | bbox] 1x1 head, bf16
    # bhead_ref: (1, COUT_LANE)       fused head bias, f32
    # out_ref:   (1, COUT_SUB, TH*W)  transposed, channel-compact output
    # band_ref:  (TH+2, W+2, CIN)     VMEM scratch: stitched halo band
    TH = body_ref.shape[1]
    W = body_ref.shape[2] - 2
    CIN = body_ref.shape[3]
    M = TH * W

    # Stitch the (TH+2)-row halo band from the two auto-pipelined inputs.
    band_ref[:TH] = body_ref[0]
    band_ref[TH:] = tail_ref[0]

    # 3x3 "same" conv = 9 shifted (M, CIN) @ (CIN, CHID) matmuls, accumulated
    # in a local f32 value (no VMEM read-modify-write accumulator).
    acc = None
    for dy in range(3):
        for dx in range(3):
            tap = band_ref[dy:dy + TH, dx:dx + W, :].reshape(M, CIN)
            part = jnp.dot(tap, wconv_ref[dy * 3 + dx],
                           preferred_element_type=jnp.float32)
            acc = part if acc is None else acc + part

    hidden = jnp.maximum(acc + bconv_ref[...], 0.0)         # bias + ReLU (f32)

    # Fused 1x1 cls/bbox head (bf16 MXU operands, f32 accumulate), then
    # transpose so the store is lane-dense along the spatial axis with only
    # 16 sublanes of channels: no 128-wide padded writeback.
    out = jnp.dot(hidden.astype(whead_ref.dtype), whead_ref[...],
                  preferred_element_type=jnp.float32) + bhead_ref[...]
    out_t = out.T                                            # (COUT_LANE, M)
    out_ref[0] = out_t[:out_ref.shape[1], :].astype(out_ref.dtype)


def prepare_rpn_head_params(conv_w, conv_b, cls_w, cls_b, bbox_w, bbox_b):
    """One-time weight prep, hoisted out of the per-call path.

    conv_w: (3, 3, C, C) HWIO; conv_b: (C,); cls_w: (C, A); cls_b: (A,);
    bbox_w: (C, 4A); bbox_b: (4A,).
    """
    C = conv_w.shape[2]
    A = cls_w.shape[-1]
    cin_p, chid_p, cout, cout_sub, cout_lane = _padded_dims(C, A)

    # 3x3 conv taps -> (9, cin_p, chid_p), zero-padded channels, bf16 operands.
    w9 = conv_w.astype(jnp.float32).reshape(9, C, C)
    wconv = jnp.pad(w9, ((0, 0), (0, cin_p - C), (0, chid_p - C)))
    bconv = jnp.zeros((1, chid_p), jnp.float32).at[0, :C].set(
        conv_b.reshape(-1).astype(jnp.float32))

    # Fused [cls | bbox] 1x1 head -> (chid_p, cout_lane), zero-padded.
    whead = jnp.zeros((chid_p, cout_lane), jnp.float32)
    whead = whead.at[:C, :A].set(cls_w.astype(jnp.float32))
    whead = whead.at[:C, A:cout].set(bbox_w.astype(jnp.float32))
    bhead = jnp.zeros((1, cout_lane), jnp.float32)
    bhead = bhead.at[0, :A].set(cls_b.reshape(-1).astype(jnp.float32))
    bhead = bhead.at[0, A:cout].set(bbox_b.reshape(-1).astype(jnp.float32))

    return {
        "wconv": wconv.astype(jnp.bfloat16),
        "bconv": bconv,
        "whead": whead.astype(jnp.bfloat16),
        "bhead": bhead,
        "in_channels": C,
        "num_anchors": A,
    }


def rpn_head_forward(x_nchw, params, *, tile_h=None):
    """x_nchw: (N, C, H, W) float32.  Returns (logits (N, A, H, W),
    bbox_pred (N, 4A, H, W)) with the same semantics as the PyTorch RPNHead."""
    N, C, H, W = x_nchw.shape
    A = params["num_anchors"]
    assert C == params["in_channels"]
    cin_p, chid_p, cout, cout_sub, cout_lane = _padded_dims(C, A)

    if tile_h is None:
        tile_h = _choose_tile_h(H, W)
    # TODO(synk): support non-divisible / odd H via a padded last band.
    assert H % tile_h == 0 and tile_h % 2 == 0
    assert (tile_h * W) % 128 == 0 or tile_h == H
    num_bands = H // tile_h
    m = tile_h * W

    # NHWC, 1px spatial zero pad, channel zero pad, bf16 MXU operands.
    # TODO(synk): accept NHWC activations from the producer (or fuse this
    # transpose+pad into the producing op) to kill this HBM round trip.
    x_nhwc = jnp.transpose(x_nchw, (0, 2, 3, 1))
    x_pad = jnp.pad(x_nhwc, ((0, 0), (1, 1), (1, 1), (0, cin_p - C)))
    x_pad = x_pad.astype(jnp.bfloat16)

    out = pl.pallas_call(
        _rpn_head_kernel,
        out_shape=jax.ShapeDtypeStruct((N, cout_sub, H * W), x_nchw.dtype),
        grid=(N, num_bands),
        in_specs=[
            # tile_h "body" rows of the padded image for band h ...
            pl.BlockSpec((1, tile_h, W + 2, cin_p),
                         lambda n, h: (n, h, 0, 0)),
            # ... plus the 2 halo rows just below the band (a second blocked
            # view of the same padded array -> no wrapper-side duplication).
            pl.BlockSpec((1, 2, W + 2, cin_p),
                         lambda n, h: (n, (h + 1) * (tile_h // 2), 0, 0)),
            pl.BlockSpec((9, cin_p, chid_p), lambda n, h: (0, 0, 0)),
            pl.BlockSpec((1, chid_p), lambda n, h: (0, 0)),
            pl.BlockSpec((chid_p, cout_lane), lambda n, h: (0, 0)),
            pl.BlockSpec((1, cout_lane), lambda n, h: (0, 0)),
        ],
        out_specs=pl.BlockSpec((1, cout_sub, m), lambda n, h: (n, 0, h)),
        scratch_shapes=[
            pltpu.VMEM((tile_h + 2, W + 2, cin_p), jnp.bfloat16),
        ],
        compiler_params=pltpu.CompilerParams(
            dimension_semantics=("parallel", "parallel"),
            # Explicit scoped-VMEM budget: comfortably under v7x's 64 MiB
            # physical VMEM, raises v5e's 16 MiB default.
            vmem_limit_bytes=32 * 1024 * 1024,
        ),
    )(x_pad, x_pad, params["wconv"], params["bconv"],
      params["whead"], params["bhead"])

    # (N, 16, H*W) -> (N, 16, H, W); slice the real channels back out.
    out = out.reshape(N, cout_sub, H, W)
    logits = out[:, :A]
    bbox = out[:, A:cout]
    return logits, bbox


def rpn_head_reference(x_nchw, conv_w, conv_b, cls_w, cls_b, bbox_w, bbox_b):
    """Pure-JAX reference with the kernel's matmul-operand precision
    (operands rounded to bf16, accumulation in f32)."""
    C = x_nchw.shape[1]
    A = cls_w.shape[-1]
    bf = lambda a: a.astype(jnp.bfloat16).astype(jnp.float32)
    dn = ("NCHW", "HWIO", "NCHW")
    hp = jax.lax.Precision.HIGHEST
    h = jax.lax.conv_general_dilated(bf(x_nchw), bf(conv_w), (1, 1), "SAME",
                                     dimension_numbers=dn, precision=hp)
    h = jax.nn.relu(h + conv_b.reshape(1, C, 1, 1))
    h = bf(h)
    logits = jax.lax.conv_general_dilated(h, bf(cls_w).reshape(1, 1, C, A),
                                          (1, 1), "SAME",
                                          dimension_numbers=dn, precision=hp)
    logits = logits + cls_b.reshape(1, A, 1, 1)
    bbox = jax.lax.conv_general_dilated(h, bf(bbox_w).reshape(1, 1, C, 4 * A),
                                        (1, 1), "SAME",
                                        dimension_numbers=dn, precision=hp)
    bbox = bbox + bbox_b.reshape(1, 4 * A, 1, 1)
    return logits, bbox


if __name__ == "__main__":
    N, C, H, W = 2, 4, 16, 16       # in_channels = 4
    A = 3                           # num_anchors = 3

    key = jax.random.PRNGKey(0)
    k_x, k_conv, k_cls, k_box = jax.random.split(key, 4)

    # nn.init.normal_(weight, std=0.01); nn.init.constant_(bias, 0)
    conv_w = 0.01 * jax.random.normal(k_conv, (3, 3, C, C), jnp.float32)  # HWIO
    conv_b = jnp.zeros((C,), jnp.float32)
    cls_w = 0.01 * jax.random.normal(k_cls, (C, A), jnp.float32)
    cls_b = jnp.zeros((A,), jnp.float32)
    bbox_w = 0.01 * jax.random.normal(k_box, (C, 4 * A), jnp.float32)
    bbox_b = jnp.zeros((4 * A,), jnp.float32)

    x = jax.random.normal(k_x, (N, C, H, W), jnp.float32)

    params = prepare_rpn_head_params(conv_w, conv_b, cls_w, cls_b,
                                     bbox_w, bbox_b)
    # tile_h=8 -> two row bands per image, exercising the halo-band path.
    logits, bbox = jax.block_until_ready(
        rpn_head_forward(x, params, tile_h=8))

    ref_logits, ref_bbox = rpn_head_reference(
        x, conv_w, conv_b, cls_w, cls_b, bbox_w, bbox_b)

    assert logits.shape == (N, A, H, W)
    assert bbox.shape == (N, 4 * A, H, W)
    assert jnp.allclose(logits, ref_logits, atol=2e-5, rtol=1e-3), (
        float(jnp.max(jnp.abs(logits - ref_logits))))
    assert jnp.allclose(bbox, ref_bbox, atol=2e-5, rtol=1e-3), (
        float(jnp.max(jnp.abs(bbox - ref_bbox))))

    print("KERNEL_OK")
</pallas_src>

<mosaic_0001>
module attributes {stable_mosaic.version = 11 : i64} {
  func.func @_rpn_head_kernel(%arg0: i32, %arg1: i32, %arg2: memref<1x8x18x8xbf16, #tpu.memory_space<vmem>>, %arg3: memref<1x2x18x8xbf16, #tpu.memory_space<vmem>>, %arg4: memref<9x8x128xbf16, #tpu.memory_space<vmem>>, %arg5: memref<1x128xf32, #tpu.memory_space<vmem>>, %arg6: memref<128x128xbf16, #tpu.memory_space<vmem>>, %arg7: memref<1x128xf32, #tpu.memory_space<vmem>>, %arg8: memref<1x16x128xf32, #tpu.memory_space<vmem>>, %arg9: memref<10x18x8xbf16, #tpu.memory_space<vmem>>) attributes {dimension_semantics = [#tpu.dimension_semantics<parallel>, #tpu.dimension_semantics<parallel>], iteration_bounds = array<i64: 2, 2>, scalar_prefetch = 0 : i64, scratch_operands = 1 : i64, tpu.core_type = #tpu.core_type<tc>, window_params = [{transform_indices = @transform_0, window_bounds = array<i64: 1, 8, 18, 8>}, {transform_indices = @transform_1, window_bounds = array<i64: 1, 2, 18, 8>}, {pipeline_mode = #tpu.pipeline_mode<synchronous>, transform_indices = @transform_2, window_bounds = array<i64: 9, 8, 128>}, {pipeline_mode = #tpu.pipeline_mode<synchronous>, transform_indices = @transform_3, window_bounds = array<i64: 1, 128>}, {pipeline_mode = #tpu.pipeline_mode<synchronous>, transform_indices = @transform_4, window_bounds = array<i64: 128, 128>}, {pipeline_mode = #tpu.pipeline_mode<synchronous>, transform_indices = @transform_5, window_bounds = array<i64: 1, 128>}, {transform_indices = @transform_6, window_bounds = array<i64: 1, 16, 128>}]} {
    %c0 = arith.constant 0 : index
    %c0_0 = arith.constant 0 : index
    %c0_1 = arith.constant 0 : index
    %c0_2 = arith.constant 0 : index
    %0 = vector.load %arg2[%c0, %c0_0, %c0_1, %c0_2] : memref<1x8x18x8xbf16, #tpu.memory_space<vmem>>, vector<1x8x18x8xbf16>
    %1 = vector.shape_cast %0 : vector<1x8x18x8xbf16> to vector<8x18x8xbf16>
    %c0_3 = arith.constant 0 : index
    %c0_4 = arith.constant 0 : index
    %c0_5 = arith.constant 0 : index
    %2 = vector.load %arg9[%c0_3, %c0_4, %c0_5] : memref<10x18x8xbf16, #tpu.memory_space<vmem>>, vector<8x18x8xbf16>
    tpu.vector_store %arg9[%c0_3, %c0_4, %c0_5], %1 {strides = array<i32>} : memref<10x18x8xbf16, #tpu.memory_space<vmem>>, vector<8x18x8xbf16>,
    %c0_6 = arith.constant 0 : index
    %c0_7 = arith.constant 0 : index
    %c0_8 = arith.constant 0 : index
    %c0_9 = arith.constant 0 : index
    %3 = vector.load %arg3[%c0_6, %c0_7, %c0_8, %c0_9] : memref<1x2x18x8xbf16, #tpu.memory_space<vmem>>, vector<1x2x18x8xbf16>
    %4 = vector.shape_cast %3 : vector<1x2x18x8xbf16> to vector<2x18x8xbf16>
    %c8 = arith.constant 8 : index
    %c0_10 = arith.constant 0 : index
    %c0_11 = arith.constant 0 : index
    %5 = vector.load %arg9[%c8, %c0_10, %c0_11] : memref<10x18x8xbf16, #tpu.memory_space<vmem>>, vector<2x18x8xbf16>
    tpu.vector_store %arg9[%c8, %c0_10, %c0_11], %4 {strides = array<i32>} : memref<10x18x8xbf16, #tpu.memory_space<vmem>>, vector<2x18x8xbf16>,
    %c0_12 = arith.constant 0 : index
    %c0_13 = arith.constant 0 : index
    %c0_14 = arith.constant 0 : index
    %6 = vector.load %arg9[%c0_12, %c0_13, %c0_14] : memref<10x18x8xbf16, #tpu.memory_space<vmem>>, vector<8x16x8xbf16>
    %7 = vector.shape_cast %6 : vector<8x16x8xbf16> to vector<128x8xbf16>
    %c0_15 = arith.constant 0 : index
    %c0_16 = arith.constant 0 : index
    %c0_17 = arith.constant 0 : index
    %8 = vector.load %arg4[%c0_15, %c0_16, %c0_17] : memref<9x8x128xbf16, #tpu.memory_space<vmem>>, vector<1x8x128xbf16>
    %9 = vector.shape_cast %8 : vector<1x8x128xbf16> to vector<8x128xbf16>
    %cst = arith.constant dense<0.000000e+00> : vector<128x128xf32>
    %10 = tpu.matmul %7, %9, %cst {dimension_numbers = #tpu.dot_dimension_numbers<[1], [0], [0], [1], [0, 0, 1, 1], [], []>} : vector<128x8xbf16>, vector<8x128xbf16>, vector<128x128xf32> -> vector<128x128xf32>
    %c0_18 = arith.constant 0 : index
    %c1 = arith.constant 1 : index
    %c0_19 = arith.constant 0 : index
    %11 = vector.load %arg9[%c0_18, %c1, %c0_19] : memref<10x18x8xbf16, #tpu.memory_space<vmem>>, vector<8x16x8xbf16>
    %12 = vector.shape_cast %11 : vector<8x16x8xbf16> to vector<128x8xbf16>
    %c1_20 = arith.constant 1 : index
    %c0_21 = arith.constant 0 : index
    %c0_22 = arith.constant 0 : index
    %13 = vector.load %arg4[%c1_20, %c0_21, %c0_22] : memref<9x8x128xbf16, #tpu.memory_space<vmem>>, vector<1x8x128xbf16>
    %14 = vector.shape_cast %13 : vector<1x8x128xbf16> to vector<8x128xbf16>
    %cst_23 = arith.constant dense<0.000000e+00> : vector<128x128xf32>
    %15 = tpu.matmul %12, %14, %cst_23 {dimension_numbers = #tpu.dot_dimension_numbers<[1], [0], [0], [1], [0, 0, 1, 1], [], []>} : vector<128x8xbf16>, vector<8x128xbf16>, vector<128x128xf32> -> vector<128x128xf32>
    %16 = arith.addf %10, %15 : vector<128x128xf32>
    %c0_24 = arith.constant 0 : index
    %c2 = arith.constant 2 : index
    %c0_25 = arith.constant 0 : index
    %17 = vector.load %arg9[%c0_24, %c2, %c0_25] : memref<10x18x8xbf16, #tpu.memory_space<vmem>>, vector<8x16x8xbf16>
    %18 = vector.shape_cast %17 : vector<8x16x8xbf16> to vector<128x8xbf16>
    %c2_26 = arith.constant 2 : index
    %c0_27 = arith.constant 0 : index
    %c0_28 = arith.constant 0 : index
    %19 = vector.load %arg4[%c2_26, %c0_27, %c0_28] : memref<9x8x128xbf16, #tpu.memory_space<vmem>>, vector<1x8x128xbf16>
    %20 = vector.shape_cast %19 : vector<1x8x128xbf16> to vector<8x128xbf16>
    %cst_29 = arith.constant dense<0.000000e+00> : vector<128x128xf32>
    %21 = tpu.matmul %18, %20, %cst_29 {dimension_numbers = #tpu.dot_dimension_numbers<[1], [0], [0], [1], [0, 0, 1, 1], [], []>} : vector<128x8xbf16>, vector<8x128xbf16>, vector<128x128xf32> -> vector<128x128xf32>
    %22 = arith.addf %16, %21 : vector<128x128xf32>
    %c1_30 = arith.constant 1 : index
    %c0_31 = arith.constant 0 : index
    %c0_32 = arith.constant 0 : index
    %23 = vector.load %arg9[%c1_30, %c0_31, %c0_32] : memref<10x18x8xbf16, #tpu.memory_space<vmem>>, vector<8x16x8xbf16>
    %24 = vector.shape_cast %23 : vector<8x16x8xbf16> to vector<128x8xbf16>
    %c3 = arith.constant 3 : index
    %c0_33 = arith.constant 0 : index
    %c0_34 = arith.constant 0 : index
    %25 = vector.load %arg4[%c3, %c0_33, %c0_34] : memref<9x8x128xbf16, #tpu.memory_space<vmem>>, vector<1x8x128xbf16>
    %26 = vector.shape_cast %25 : vector<1x8x128xbf16> to vector<8x128xbf16>
    %cst_35 = arith.constant dense<0.000000e+00> : vector<128x128xf32>
    %27 = tpu.matmul %24, %26, %cst_35 {dimension_numbers = #tpu.dot_dimension_numbers<[1], [0], [0], [1], [0, 0, 1, 1], [], []>} : vector<128x8xbf16>, vector<8x128xbf16>, vector<128x128xf32> -> vector<128x128xf32>
    %28 = arith.addf %22, %27 : vector<128x128xf32>
    %c1_36 = arith.constant 1 : index
    %c1_37 = arith.constant 1 : index
    %c0_38 = arith.constant 0 : index
    %29 = vector.load %arg9[%c1_36, %c1_37, %c0_38] : memref<10x18x8xbf16, #tpu.memory_space<vmem>>, vector<8x16x8xbf16>
    %30 = vector.shape_cast %29 : vector<8x16x8xbf16> to vector<128x8xbf16>
    %c4 = arith.constant 4 : index
    %c0_39 = arith.constant 0 : index
    %c0_40 = arith.constant 0 : index
    %31 = vector.load %arg4[%c4, %c0_39, %c0_40] : memref<9x8x128xbf16, #tpu.memory_space<vmem>>, vector<1x8x128xbf16>
    %32 = vector.shape_cast %31 : vector<1x8x128xbf16> to vector<8x128xbf16>
    %cst_41 = arith.constant dense<0.000000e+00> : vector<128x128xf32>
    %33 = tpu.matmul %30, %32, %cst_41 {dimension_numbers = #tpu.dot_dimension_numbers<[1], [0], [0], [1], [0, 0, 1, 1], [], []>} : vector<128x8xbf16>, vector<8x128xbf16>, vector<128x128xf32> -> vector<128x128xf32>
    %34 = arith.addf %28, %33 : vector<128x128xf32>
    %c1_42 = arith.constant 1 : index
    %c2_43 = arith.constant 2 : index
    %c0_44 = arith.constant 0 : index
    %35 = vector.load %arg9[%c1_42, %c2_43, %c0_44] : memref<10x18x8xbf16, #tpu.memory_space<vmem>>, vector<8x16x8xbf16>
    %36 = vector.shape_cast %35 : vector<8x16x8xbf16> to vector<128x8xbf16>
    %c5 = arith.constant 5 : index
    %c0_45 = arith.constant 0 : index
    %c0_46 = arith.constant 0 : index
    %37 = vector.load %arg4[%c5, %c0_45, %c0_46] : memref<9x8x128xbf16, #tpu.memory_space<vmem>>, vector<1x8x128xbf16>
    %38 = vector.shape_cast %37 : vector<1x8x128xbf16> to vector<8x128xbf16>
    %cst_47 = arith.constant dense<0.000000e+00> : vector<128x128xf32>
    %39 = tpu.matmul %36, %38, %cst_47 {dimension_numbers = #tpu.dot_dimension_numbers<[1], [0], [0], [1], [0, 0, 1, 1], [], []>} : vector<128x8xbf16>, vector<8x128xbf16>, vector<128x128xf32> -> vector<128x128xf32>
    %40 = arith.addf %34, %39 : vector<128x128xf32>
    %c2_48 = arith.constant 2 : index
    %c0_49 = arith.constant 0 : index
    %c0_50 = arith.constant 0 : index
    %41 = vector.load %arg9[%c2_48, %c0_49, %c0_50] : memref<10x18x8xbf16, #tpu.memory_space<vmem>>, vector<8x16x8xbf16>
    %42 = vector.shape_cast %41 : vector<8x16x8xbf16> to vector<128x8xbf16>
    %c6 = arith.constant 6 : index
    %c0_51 = arith.constant 0 : index
    %c0_52 = arith.constant 0 : index
    %43 = vector.load %arg4[%c6, %c0_51, %c0_52] : memref<9x8x128xbf16, #tpu.memory_space<vmem>>, vector<1x8x128xbf16>
    %44 = vector.shape_cast %43 : vector<1x8x128xbf16> to vector<8x128xbf16>
    %cst_53 = arith.constant dense<0.000000e+00> : vector<128x128xf32>
    %45 = tpu.matmul %42, %44, %cst_53 {dimension_numbers = #tpu.dot_dimension_numbers<[1], [0], [0], [1], [0, 0, 1, 1], [], []>} : vector<128x8xbf16>, vector<8x128xbf16>, vector<128x128xf32> -> vector<128x128xf32>
    %46 = arith.addf %40, %45 : vector<128x128xf32>
    %c2_54 = arith.constant 2 : index
    %c1_55 = arith.constant 1 : index
    %c0_56 = arith.constant 0 : index
    %47 = vector.load %arg9[%c2_54, %c1_55, %c0_56] : memref<10x18x8xbf16, #tpu.memory_space<vmem>>, vector<8x16x8xbf16>
    %48 = vector.shape_cast %47 : vector<8x16x8xbf16> to vector<128x8xbf16>
    %c7 = arith.constant 7 : index
    %c0_57 = arith.constant 0 : index
    %c0_58 = arith.constant 0 : index
    %49 = vector.load %arg4[%c7, %c0_57, %c0_58] : memref<9x8x128xbf16, #tpu.memory_space<vmem>>, vector<1x8x128xbf16>
    %50 = vector.shape_cast %49 : vector<1x8x128xbf16> to vector<8x128xbf16>
    %cst_59 = arith.constant dense<0.000000e+00> : vector<128x128xf32>
    %51 = tpu.matmul %48, %50, %cst_59 {dimension_numbers = #tpu.dot_dimension_numbers<[1], [0], [0], [1], [0, 0, 1, 1], [], []>} : vector<128x8xbf16>, vector<8x128xbf16>, vector<128x128xf32> -> vector<128x128xf32>
    %52 = arith.addf %46, %51 : vector<128x128xf32>
    %c2_60 = arith.constant 2 : index
    %c2_61 = arith.constant 2 : index
    %c0_62 = arith.constant 0 : index
    %53 = vector.load %arg9[%c2_60, %c2_61, %c0_62] : memref<10x18x8xbf16, #tpu.memory_space<vmem>>, vector<8x16x8xbf16>
    %54 = vector.shape_cast %53 : vector<8x16x8xbf16> to vector<128x8xbf16>
    %c8_63 = arith.constant 8 : index
    %c0_64 = arith.constant 0 : index
    %c0_65 = arith.constant 0 : index
    %55 = vector.load %arg4[%c8_63, %c0_64, %c0_65] : memref<9x8x128xbf16, #tpu.memory_space<vmem>>, vector<1x8x128xbf16>
    %56 = vector.shape_cast %55 : vector<1x8x128xbf16> to vector<8x128xbf16>
    %cst_66 = arith.constant dense<0.000000e+00> : vector<128x128xf32>
    %57 = tpu.matmul %54, %56, %cst_66 {dimension_numbers = #tpu.dot_dimension_numbers<[1], [0], [0], [1], [0, 0, 1, 1], [], []>} : vector<128x8xbf16>, vector<8x128xbf16>, vector<128x128xf32> -> vector<128x128xf32>
    %58 = arith.addf %52, %57 : vector<128x128xf32>
    %c0_67 = arith.constant 0 : index
    %c0_68 = arith.constant 0 : index
    %59 = vector.load %arg5[%c0_67, %c0_68] : memref<1x128xf32, #tpu.memory_space<vmem>>, vector<1x128xf32>
    %60 = vector.broadcast %59 : vector<1x128xf32> to vector<128x128xf32>
    %61 = arith.addf %58, %60 : vector<128x128xf32>
    %cst_69 = arith.constant 0.000000e+00 : f32
    %62 = vector.broadcast %cst_69 : f32 to vector<128x128xf32>
    %63 = arith.maximumf %61, %62 : vector<128x128xf32>
    %64 = arith.truncf %63 : vector<128x128xf32> to vector<128x128xbf16>
    %c0_70 = arith.constant 0 : index
    %c0_71 = arith.constant 0 : index
    %65 = vector.load %arg6[%c0_70, %c0_71] : memref<128x128xbf16, #tpu.memory_space<vmem>>, vector<128x128xbf16>
    %cst_72 = arith.constant dense<0.000000e+00> : vector<128x128xf32>
    %66 = tpu.matmul %64, %65, %cst_72 {dimension_numbers = #tpu.dot_dimension_numbers<[1], [0], [0], [1], [0, 0, 1, 1], [], []>} : vector<128x128xbf16>, vector<128x128xbf16>, vector<128x128xf32> -> vector<128x128xf32>
    %c0_73 = arith.constant 0 : index
    %c0_74 = arith.constant 0 : index
    %67 = vector.load %arg7[%c0_73, %c0_74] : memref<1x128xf32, #tpu.memory_space<vmem>>, vector<1x128xf32>
    %68 = vector.broadcast %67 : vector<1x128xf32> to vector<128x128xf32>
    %69 = arith.addf %66, %68 : vector<128x128xf32>
    %70 = tpu.transpose %69, [1, 0] : vector<128x128xf32> -> vector<128x128xf32>
    %71 = vector.extract_strided_slice %70 {offsets = [0, 0], sizes = [16, 128], strides = [1, 1]} : vector<128x128xf32> to vector<16x128xf32>
    %c0_75 = arith.constant 0 : index
    %c0_76 = arith.constant 0 : index
    %c0_77 = arith.constant 0 : index
    %72 = vector.load %arg8[%c0_75, %c0_76, %c0_77] : memref<1x16x128xf32, #tpu.memory_space<vmem>>, vector<1x16x128xf32>
    %73 = vector.shape_cast %72 : vector<1x16x128xf32> to vector<16x128xf32>
    %74 = vector.shape_cast %71 : vector<16x128xf32> to vector<1x16x128xf32>
    tpu.vector_store %arg8[%c0_75, %c0_76, %c0_77], %74 {strides = array<i32>} : memref<1x16x128xf32, #tpu.memory_space<vmem>>, vector<1x16x128xf32>,
    return
  }
  func.func @transform_0(%arg0: i32, %arg1: i32) -> (i32, i32, i32, i32) {
    %c0_i32 = arith.constant 0 : i32
    %c0_i32_0 = arith.constant 0 : i32
    %c0_i32_1 = arith.constant 0 : i32
    return %arg0, %arg1, %c0_i32, %c0_i32_0 : i32, i32, i32, i32
  }
  func.func @transform_1(%arg0: i32, %arg1: i32) -> (i32, i32, i32, i32) {
    %c1_i32 = arith.constant 1 : i32
    %0 = arith.addi %arg1, %c1_i32 : i32
    %c4_i32 = arith.constant 4 : i32
    %1 = arith.muli %0, %c4_i32 : i32
    %c0_i32 = arith.constant 0 : i32
    %c0_i32_0 = arith.constant 0 : i32
    %c0_i32_1 = arith.constant 0 : i32
    return %arg0, %1, %c0_i32, %c0_i32_0 : i32, i32, i32, i32
  }
  func.func @transform_2(%arg0: i32, %arg1: i32) -> (i32, i32, i32) {
    %c0_i32 = arith.constant 0 : i32
    %c0_i32_0 = arith.constant 0 : i32
    %c0_i32_1 = arith.constant 0 : i32
    %c0_i32_2 = arith.constant 0 : i32
    return %c0_i32, %c0_i32_0, %c0_i32_1 : i32, i32, i32
  }
  func.func @transform_3(%arg0: i32, %arg1: i32) -> (i32, i32) {
    %c0_i32 = arith.constant 0 : i32
    %c0_i32_0 = arith.constant 0 : i32
    %c0_i32_1 = arith.constant 0 : i32
    return %c0_i32, %c0_i32_0 : i32, i32
  }
  func.func @transform_4(%arg0: i32, %arg1: i32) -> (i32, i32) {
    %c0_i32 = arith.constant 0 : i32
    %c0_i32_0 = arith.constant 0 : i32
    %c0_i32_1 = arith.constant 0 : i32
    return %c0_i32, %c0_i32_0 : i32, i32
  }
  func.func @transform_5(%arg0: i32, %arg1: i32) -> (i32, i32) {
    %c0_i32 = arith.constant 0 : i32
    %c0_i32_0 = arith.constant 0 : i32
    %c0_i32_1 = arith.constant 0 : i32
    return %c0_i32, %c0_i32_0 : i32, i32
  }
  func.func @transform_6(%arg0: i32, %arg1: i32) -> (i32, i32, i32) {
    %c0_i32 = arith.constant 0 : i32
    %c0_i32_0 = arith.constant 0 : i32
    return %arg0, %c0_i32, %arg1 : i32, i32, i32
  }
}

</mosaic_0001>

<bundles_post_ra>
// kernel: tpu_custom_call.1
= control target key start
LH: loop header
LB: loop body
LE: loop exit
PB: predicated region body
PF: predicated region fallthrough
CT: control target
= control target key end

     0   :  { %11 = vsyncpa [#allocation4], 0  ;;  %s5156_s0 = inlined_call_operand.vmem [shape: bf16[2,18,18,8], index: 0, kind: input, shape index: {}]   ;;  %s5157_s1 = inlined_call_operand.vmem [shape: bf16[2,18,18,8], index: 1, kind: input, shape index: {}]   ;;  %s5158_s2 = inlined_call_operand.vmem [shape: bf16[9,8,128], index: 2, kind: input, shape index: {}]   ;;  %s5159_s3 = inlined_call_operand.vmem [shape: f32[1,128], index: 3, kind: input, shape index: {}]   ;;  %s5160_s4 = inlined_call_operand.vmem [shape: bf16[128,128], index: 4, kind: input, shape index: {}]   ;;  %s5161_s5 = inlined_call_operand.vmem [shape: f32[1,128], index: 5, kind: input, shape index: {}]   ;;  %s5162_s6 = inlined_call_operand.hbm [shape: f32[2,16,256], index: 6, kind: output, shape index: {}]  }
   0x1   :  { %13 = vsyncpa [#allocation4 + $0x1], 0  ;;  %s4005_s21 = smov 0   ;;  %s4007_s22 = smov 0  }
   0x2   :  { %s4009_s23 = smov 0   ;;  %s4011_s24 = smov 0  }
   0x3   :  { %s4013_s25 = smov 0   ;;  %s4015_s26 = smov 0  }
   0x4   :  { %s4017_s27 = smov 0   ;;  %s4019_s28 = smov 0  }
   0x5 LB: > { %s3249_s29 = sadd.s32 4294967295, %s3964_s28   ;;  %s3250_s30 = sadd.s32 4294967294, %s3964_s28   ;;  %s3964_s28 = sphi %s4019_s28, %s19_s28   ;;  %s3960_s27 = sphi %s4017_s27, %s5230_s27   ;;  %s3956_s26 = sphi %s4015_s26, %s5229_s26   ;;  %s3952_s25 = sphi %s4013_s25, %s5228_s25   ;;  %s3948_s24 = sphi %s4011_s24, %s5227_s24   ;;  %s3944_s23 = sphi %s4009_s23, %s5226_s23   ;;  %s3940_s22 = sphi %s4007_s22, %s5225_s22   ;;  %s3936_s21 = sphi %s4005_s21, %s5224_s21  }
   0x6   : > { %s28_s7 = sadd.s32 1, %s3956_s26  ;;  %s31_s8 = sadd.s32 1, %s3960_s27 }
   0x7   : > { %p29_p0 = scmp.ge.s32.totalorder %s28_s7, 2  ;;  %p194_p1 = scmp.ne.s32.totalorder %s3944_s23, %s3940_s22 }
   0x8   : > { %p195_p2 = scmp.eq.s32.totalorder %s3249_s29, 3  ;;  %p200_p5 = scmp.ne.s32.totalorder %s3940_s22, %s3936_s21 }
   0x9   : > { %s5232_s7 = smov (%p29_p0, %s28_s7), 0  ;;  %s5234_s8 = smov (!%p29_p0, %s31_s8), %s3960_s27 }
   0xa   : > { %s180_s9 = ssub.s32 %s3956_s26, %s5232_s7  ;;  %p4056_p3 = por %p195_p2, %p194_p1 }
   0xb   : > { %p33_p4 = scmp.ge.s32.totalorder %s5234_s8, 2  ;;  %p201_p6 = scmp.eq.s32.totalorder %s3250_s30, 3 }
   0xc   : > { %p3255_p7 = scmp.ge.s32.totalorder %s3964_s28, 1  ;;  %p273_p9 = scmp.lt.s32.totalorder %s3964_s28, 5 }
   0xd   : > { %s5236_s8 = smov (%p33_p4, %s5234_s8), 0  ;;  %p4065_p8 = por %p201_p6, %p200_p5 }
   0xe   : > { %s179_s12 = ssub.s32 %s3960_s27, %s5236_s8  ;;  %s184_s13 = sadd.s32 1, %s3944_s23 }
   0xf   : > { %s181_s14 = sor.u32 %s180_s9, %s179_s12  ;;  %p274_p10 = pnand %p3255_p7, %p273_p9 }
  0x10   : > { %p182_p11 = scmp.eq.s32.totalorder %s181_s14, 0 }
  0x11   : > { %277 = sbr.rel (%p274_p10) target bundleno = 746 (0x2ea), region = 44 }
  0x12   : > { %s4074_s15 = scalar_select %p182_p11, %s3944_s23, %s184_s13  }
  0x16   : > { %v3262_v0 = vld [vmem:[%s5158_s2 + $0x4] sm:$0xf]  ;;  %vm696_vm0 = vcmask 1043456   ;;  %v441_v1 = vld [vmem:[%s5158_s2] sm:$0xf]  ;;  %s4083_s20 = sshll.u32 %s3948_s24, 3 }
  0x17   : > { %3753 = vmatprep.subr.msk.bf16.mxu0 %vm696_vm0, %v3262_v0  ;;  %v698_v2 = vsel %vm696_vm0, %v3262_v0, 0  ;;  %3754 = vmatprep.subr.msk.bf16.mxu1 %vm696_vm0, %v441_v1  ;;  %v862_v3 = vsel %vm696_vm0, %v441_v1, 0  ;;  %p331_p12 = scmp.lt.s32.totalorder %s3952_s25, 1  ;;  %p333_p13 = scmp.lt.s32.totalorder %s4083_s20, 17  ;;  %v3303_v4 = vld [vmem:[%s5158_s2 + $0x8] sm:$0xf] }
  0x18   : > { %3560 = vmatpush3.bf16.msra.mxu0 %v698_v2  ;;  %3578 = vmatpush3.bf16.msra.mxu1 %v862_v3  ;;  %v3320_v5 = vld [vmem:[%s5158_s2 + $0xc] sm:$0xf]  ;;  %v4106_v6 = vld [vmem:[%s5158_s2 + $0x10] sm:$0xf]  ;;  %vm386_vm1 = vcmask 60416   ;;  %vm389_vm2 = vcmask 57344  }
  0x19   : > { %s4092_s29 = scalar_select %p331_p12, %s3952_s25, 1  ;;  %3755 = vmatprep.subr.msk.bf16.mxu0 %vm696_vm0, %v3303_v4  ;;  %3756 = vmatprep.subr.msk.bf16.mxu1 %vm696_vm0, %v3320_v5  ;;  %v4112_v7 = vld [vmem:[%s5158_s2 + $0x14] sm:$0xf]  ;;  %v4115_v8 = vsel %vm696_vm0, %v3303_v4, 0  ;;  %v4118_v9 = vsel %vm696_vm0, %v3320_v5, 0  ;;  %v4127_v11 = vsel %vm696_vm0, %v4106_v6, 0 }
  0x1a   : > { %s334_s14 = scalar_select %p333_p13, %s4083_s20, 17  ;;  %v4123_v10 = vld [vmem:[%s5158_s2 + $0x18] sm:$0xf]  ;;  %v4131_v12 = vsel %vm696_vm0, %v4112_v7, 0  ;;  %v4136_v13 = vld [vmem:[%s5158_s2 + $0x1c] sm:$0xf] }
  0x1b   : > { %s3763_s18 = smul.u32 54, %s4092_s29  ;;  %v3421_v14 = vld [vmem:[%s5158_s2 + $0x20] sm:$0xf]  ;;  %v4145_v15 = vsel %vm696_vm0, %v4123_v10, 0  ;;  %v4149_v16 = vsel %vm696_vm0, %v4136_v13, 0  ;;  %vm671_vm3 = vcmask 64512  }
  0x1c   : > { %s3762_s9 = smul.u32 3, %s334_s14  ;;  %v4152_v17 = vsel %vm696_vm0, %v3421_v14, 0  ;;  %vm450_vm4 = vsmask.f32 3328  ;;  %vm451_vm5 = vsmask.f32 7440 }
  0x1d   : > { %vm4226_vm6 = vmor %vm450_vm4, %vm451_vm5  ;;  %vm985_vm7 = vcmask 1042432   ;;  %vm986_vm8 = vcmask 1046532   ;;  %s322_s13 = sand.u32 1, %s3940_s22   ;;  %s3449_s14 = sshll.u32 %s3952_s25, 2 }
  0x1e   : > { %s337_s30 = sadd.s32 %s3763_s18, %s3762_s9  ;;  %s3461_s9 = sadd.s32 8, %s4083_s20  ;;  %vm4352_vm9 = vmor %vm985_vm7, %vm986_vm8 }
  0x1f   : > { %s3258_s12 = sshll.u32 %s337_s30, 2  ;;  %p4271_p0 = scmp.lt.s32.totalorder %s3461_s9, 17 }
  0x20   : > { %s4157_s16 = scalar_lea.vmem %s5156_s0, %s3258_s12  ;;  %s5105_s25 = scalar_lea.sflag [#allocation4], %s322_s13 }
  0x21   : > { %v362_v18 = vld [vmem:[%s4157_s16] sm:$0xf]  ;;  %v363_v19 = vld [vmem:[%s4157_s16 + $0x4] sm:$0xf]  ;;  %v364_v20 = vld [vmem:[%s4157_s16 + $0x8] sm:$0x1] }
  0x22   : > { %387 = vst.msk [vmem:[#allocation2] sm:$0xf] %vm386_vm1, %v362_v18  ;;  %388 = vst.msk [vmem:[#allocation2 + $0x4] sm:$0xf] %vm386_vm1, %v363_v19  ;;  %v365_v21 = vld [vmem:[%s4157_s16 + $0xc] sm:$0xf] }
  0x23   : > { %390 = vst.msk [vmem:[#allocation2 + $0x8] sm:$0x1] %vm389_vm2, %v364_v20  ;;  %v366_v22 = vld [vmem:[%s4157_s16 + $0x10] sm:$0xf]  ;;  %v367_v23 = vld [vmem:[%s4157_s16 + $0x14] sm:$0x1] }
  0x24   : > { %391 = vst.msk [vmem:[#allocation2 + $0xc] sm:$0xf] %vm386_vm1, %v365_v21  ;;  %392 = vst.msk [vmem:[#allocation2 + $0x10] sm:$0xf] %vm386_vm1, %v366_v22  ;;  %v368_v24 = vld [vmem:[%s4157_s16 + $0x18] sm:$0xf] }
  0x25   : > { %393 = vst.msk [vmem:[#allocation2 + $0x14] sm:$0x1] %vm389_vm2, %v367_v23  ;;  %v369_v25 = vld [vmem:[%s4157_s16 + $0x1c] sm:$0xf]  ;;  %v370_v26 = vld [vmem:[%s4157_s16 + $0x20] sm:$0x1] }
  0x26   : > { %394 = vst.msk [vmem:[#allocation2 + $0x18] sm:$0xf] %vm386_vm1, %v368_v24  ;;  %395 = vst.msk [vmem:[#allocation2 + $0x1c] sm:$0xf] %vm386_vm1, %v369_v25  ;;  %v371_v27 = vld [vmem:[%s4157_s16 + $0x24] sm:$0xf] }
  0x27   : > { %396 = vst.msk [vmem:[#allocation2 + $0x20] sm:$0x1] %vm389_vm2, %v370_v26  ;;  %v372_v28 = vld [vmem:[%s4157_s16 + $0x28] sm:$0xf]  ;;  %v373_v29 = vld [vmem:[%s4157_s16 + $0x2c] sm:$0x1] }
  0x28   : > { %397 = vst.msk [vmem:[#allocation2 + $0x24] sm:$0xf] %vm386_vm1, %v371_v27  ;;  %398 = vst.msk [vmem:[#allocation2 + $0x28] sm:$0xf] %vm386_vm1, %v372_v28  ;;  %v374_v30 = vld [vmem:[%s4157_s16 + $0x30] sm:$0xf] }
  0x29   : > { %399 = vst.msk [vmem:[#allocation2 + $0x2c] sm:$0x1] %vm389_vm2, %v373_v29  ;;  %v375_v31 = vld [vmem:[%s4157_s16 + $0x34] sm:$0xf]  ;;  %v376_v32 = vld [vmem:[%s4157_s16 + $0x38] sm:$0x1] }
  0x2a   : > { %400 = vst.msk [vmem:[#allocation2 + $0x30] sm:$0xf] %vm386_vm1, %v374_v30  ;;  %401 = vst.msk [vmem:[#allocation2 + $0x34] sm:$0xf] %vm386_vm1, %v375_v31  ;;  %v377_v33 = vld [vmem:[%s4157_s16 + $0x3c] sm:$0xf] }
  0x2b   : > { %402 = vst.msk [vmem:[#allocation2 + $0x38] sm:$0x1] %vm389_vm2, %v376_v32  ;;  %v378_v34 = vld [vmem:[%s4157_s16 + $0x40] sm:$0xf]  ;;  %v379_v35 = vld [vmem:[%s4157_s16 + $0x44] sm:$0x1] }
  0x2c   : > { %403 = vst.msk [vmem:[#allocation2 + $0x3c] sm:$0xf] %vm386_vm1, %v377_v33  ;;  %404 = vst.msk [vmem:[#allocation2 + $0x40] sm:$0xf] %vm386_vm1, %v378_v34  ;;  %v380_v36 = vld [vmem:[%s4157_s16 + $0x48] sm:$0xf] }
  0x2d   : > { %405 = vst.msk [vmem:[#allocation2 + $0x44] sm:$0x1] %vm389_vm2, %v379_v35  ;;  %v381_v37 = vld [vmem:[%s4157_s16 + $0x4c] sm:$0xf]  ;;  %v382_v38 = vld [vmem:[%s4157_s16 + $0x50] sm:$0x1] }
  0x2e   : > { %406 = vst.msk [vmem:[#allocation2 + $0x48] sm:$0xf] %vm386_vm1, %v380_v36  ;;  %407 = vst.msk [vmem:[#allocation2 + $0x4c] sm:$0xf] %vm386_vm1, %v381_v37  ;;  %v383_v39 = vld [vmem:[%s4157_s16 + $0x54] sm:$0xf] }
  0x2f   : > { %408 = vst.msk [vmem:[#allocation2 + $0x50] sm:$0x1] %vm389_vm2, %v382_v38  ;;  %v384_v40 = vld [vmem:[%s4157_s16 + $0x58] sm:$0xf]  ;;  %v385_v41 = vld [vmem:[%s4157_s16 + $0x5c] sm:$0x1] }
  0x30   : > { %v425_v42 = vld [vmem:[#allocation2] sm:$0xf]  ;;  %v4204_v43 = vld [vmem:[#allocation2 + $0x4] sm:$0xf]  ;;  %v4206_v44 = vld [vmem:[#allocation2 + $0x8] sm:$0x1] }
  0x31   : > { %409 = vst.msk [vmem:[#allocation2 + $0x54] sm:$0xf] %vm386_vm1, %v383_v39  ;;  %410 = vst.msk [vmem:[#allocation2 + $0x58] sm:$0xf] %vm386_vm1, %v384_v40  ;;  %v454_v45 = vshrl.u32 %v425_v42, 16  ;;  %v457_v46 = vshll.u32 %v425_v42, 16  ;;  %v3279_v52 = vcombine.low %v425_v42, %v4204_v43 }
  0x32   : > { %411 = vst.msk [vmem:[#allocation2 + $0x5c] sm:$0x1] %vm389_vm2, %v385_v41  ;;  %v463_v47 = vshll.u32 %v4204_v43, 16  ;;  %v467_v48 = vshrl.u32 %v4204_v43, 16  ;;  %v427_v49 = vld [vmem:[#allocation2 + $0xc] sm:$0xf] }
  0x33   : > { %v473_v50 = vshll.u32 %v4206_v44, 16  ;;  %v993_v51 = vrot.slane %v4206_v44, 5  ;;  %v4216_v53 = vld [vmem:[#allocation2 + $0x10] sm:$0xf]  ;;  %v4218_v54 = vld [vmem:[#allocation2 + $0x14] sm:$0x1]  ;;  %3579 = vmatprep.mubr.msk.bf16.mxu1 %vm671_vm3, %v3279_v52 }
  0x34   : > { %v456_v55 = vrot.slane %v454_v45, 4  ;;  %v459_v56 = vrot.slane %v457_v46, 5  ;;  %v465_v57 = vrot.slane %v463_v47, 5  ;;  %v469_v58 = vrot.slane %v467_v48, 4  ;;  %v429_v3 = vld [vmem:[#allocation2 + $0x18] sm:$0xf] }
  0x35   : > { %v475_v59 = vrot.slane %v473_v50, 5  ;;  %v478_v60 = vshrl.u32 %v427_v49, 16  ;;  %v481_v61 = vshll.u32 %v427_v49, 16  ;;  %v487_v62 = vshll.u32 %v4216_v53, 16  ;;  %v4231_v24 = vld [vmem:[#allocation2 + $0x1c] sm:$0xf] }
  0x36   : > { %v460_v63 = vor.u32 %v459_v56, %v456_v55  ;;  %v470_v0 = vor.u32 %v469_v58, %v465_v57  ;;  %v491_v1 = vshrl.u32 %v4216_v53, 16  ;;  %v497_v2 = vshll.u32 %v4218_v54, 16  ;;  %v4235_v28 = vld [vmem:[#allocation2 + $0x20] sm:$0x1]  ;;  %v431_v34 = vld [vmem:[#allocation2 + $0x24] sm:$0xf] }
  0x37   : > { %v480_v5 = vrot.slane %v478_v60, 4  ;;  %v483_v14 = vrot.slane %v481_v61, 5  ;;  %v489_v18 = vrot.slane %v487_v62, 5  ;;  %v997_v19 = vrot.slane %v4216_v53, 5  ;;  %v4245_v45 = vld [vmem:[#allocation2 + $0x28] sm:$0xf] }
  0x38   : > { %v461_v20 = vrot.slane %v460_v63, 4  ;;  %v471_v21 = vrot.slane %v470_v0, 4  ;;  %v493_v22 = vrot.slane %v491_v1, 4  ;;  %v499_v23 = vrot.slane %v497_v2, 5  ;;  %v4263_v1 = vld [vmem:[#allocation2 + $0x34] sm:$0xf] }
  0x39   : > { %v484_v25 = vor.u32 %v483_v14, %v480_v5  ;;  %v1000_v26 = vrot.slane %v4218_v54, 5  ;;  %v3280_v27 = vcombine.low %v427_v49, %v4216_v53  ;;  %v502_v29 = vshrl.u32 %v429_v3, 16  ;;  %v4252_v49 = vld [vmem:[#allocation2 + $0x2c] sm:$0x1]  ;;  %v4267_v14 = vld [vmem:[#allocation2 + $0x38] sm:$0x1] }
  0x3a   : > { %v466_v30 = vsel %vm4226_vm6, %v461_v20, %v465_v57  ;;  %v476_v31 = vsel %vm4226_vm6, %v471_v21, %v475_v59  ;;  %v494_v32 = vor.u32 %v493_v22, %v489_v18  ;;  %v505_v33 = vshll.u32 %v429_v3, 16  ;;  %v433_v57 = vld [vmem:[#allocation2 + $0x30] sm:$0xf]  ;;  %s5238_s9 = smov (!%p4271_p0, %s3461_s9), 17  ;;  %s3256_s16 = sshll.u32 %s322_s13, 4 }
  0x3b   : > { %v3263_v35 = vcombine.low %v466_v30, %v476_v31  ;;  %v485_v36 = vrot.slane %v484_v25, 4  ;;  %3580 = vmatmul.mubr.msk.bf16.vlgmr.msra.gmra.mxu1 %vm671_vm3, %v3280_v27  ;;  %v504_v37 = vrot.slane %v502_v29, 4  ;;  %v511_v38 = vshll.u32 %v4231_v24, 16  ;;  %v435_v25 = vld [vmem:[#allocation2 + $0x3c] sm:$0xf]  ;;  %s3764_s20 = smul.u32 3, %s5238_s9  ;;  %s3141_s9 = sadd.s32 %s3948_s24, %s3449_s14 }
  0x3c   : > { %v495_v39 = vrot.slane %v494_v32, 4  ;;  %v507_v40 = vrot.slane %v505_v33, 5  ;;  %v515_v41 = vshrl.u32 %v4231_v24, 16  ;;  %v521_v42 = vshll.u32 %v4235_v28, 16  ;;  %3614 = vmatpush3.bf16.msra.mxu1 %v4118_v9  ;;  %v4280_v32 = vld [vmem:[#allocation2 + $0x40] sm:$0xf] }
  0x3d   : > { %3561 = vmatprep.mubr.msk.bf16.mxu0 %vm671_vm3, %v3263_v35  ;;  %v490_v46 = vsel %vm4226_vm6, %v485_v36, %v489_v18  ;;  %v513_v47 = vrot.slane %v511_v38, 5  ;;  %v3281_v48 = vcombine.low %v429_v3, %v4231_v24  ;;  %v526_v50 = vshrl.u32 %v431_v34, 16  ;;  %3758 = vmatprep.subr.msk.bf16.mxu1 %vm696_vm0, %v4112_v7  ;;  %s355_s19 = sadd.s32 %s3764_s20, %s3763_s18  ;;  %s324_s17 = scalar_lea.vmem [#allocation3], %s3256_s16 }
  0x3e   : > { %v500_v52 = vsel %vm4226_vm6, %v495_v39, %v499_v23  ;;  %v508_v55 = vor.u32 %v507_v40, %v504_v37  ;;  %v517_v56 = vrot.slane %v515_v41, 4  ;;  %v523_v9 = vrot.slane %v521_v42, 5  ;;  %s3261_s30 = sshll.u32 %s355_s19, 2  ;;  %s3144_s20 = sshll.u32 %s324_s17, 4  ;;  %s5098_s20 = int_to_ptr.vmem [resolvable:$true] %s3144_s20 }
  0x3f   : > { %v3264_v58 = vcombine.low %v490_v46, %v500_v52  ;;  %3583 = vmatprep.mubr.msk.bf16.mxu1 %vm671_vm3, %v3281_v48  ;;  %v528_v59 = vrot.slane %v526_v50, 4  ;;  %v529_v60 = vshll.u32 %v431_v34, 16  ;;  %v535_v61 = vshll.u32 %v4245_v45, 16  ;;  %v4295_v46 = vld [vmem:[#allocation2 + $0x44] sm:$0x1]  ;;  %s4330_s12 = scalar_lea.vmem %s5157_s1, %s3261_s30  ;;  %s3450_s19 = sshll.u32 %s3141_s9, 7 }
  0x40   : > { %v509_v62 = vrot.slane %v508_v55, 4  ;;  %v518_v63 = vor.u32 %v517_v56, %v513_v47  ;;  %v539_v7 = vshrl.u32 %v4245_v45, 16  ;;  %v545_v0 = vshll.u32 %v4252_v49, 16  ;;  %v437_v55 = vld [vmem:[#allocation2 + $0x48] sm:$0xf]  ;;  %s5103_s18 = scalar_lea.hbm %s5162_s6, %s3450_s19  ;;  %s3872_s24 = scalar_lea.vmem %s5098_s20, 256 }
  0x41   : > { %3562 = vmatmul.mubr.msk.bf16.vlgmr.msra.gmra.mxu0 %vm671_vm3, %v3264_v58  ;;  %v531_v2 = vrot.slane %v529_v60, 5  ;;  %v537_v3 = vrot.slane %v535_v61, 5  ;;  %v3282_v5 = vcombine.low %v431_v34, %v4245_v45  ;;  %v550_v18 = vshrl.u32 %v433_v57, 16  ;;  %p3873_p1 = scmp.ne.s32.totalorder %s5098_s20, %s3872_s24 }
  0x42   : > { %3596 = vmatpush3.bf16.msra.mxu0 %v4115_v8  ;;  %v514_v20 = vsel %vm4226_vm6, %v509_v62, %v513_v47  ;;  %v519_v21 = vrot.slane %v518_v63, 4  ;;  %v541_v22 = vrot.slane %v539_v7, 4  ;;  %v547_v23 = vrot.slane %v545_v0, 5 }
  0x43   : > { %v532_v27 = vor.u32 %v531_v2, %v528_v59  ;;  %3584 = vmatmul.mubr.msk.bf16.gmra.mxu1 %vm671_vm3, %v3282_v5  ;;  %v552_v29 = vrot.slane %v550_v18, 4  ;;  %v553_v30 = vshll.u32 %v433_v57, 16  ;;  %v559_v31 = vshll.u32 %v4263_v1, 16  ;;  %3757 = vmatprep.subr.msk.bf16.mxu0 %vm696_vm0, %v4106_v6  ;;  %v4305_v59 = vld [vmem:[#allocation2 + $0x4c] sm:$0xf]  ;;  %p3874_p2 = pnand %p3873_p1, %p4056_p3 }
  0x44   : > { %v524_v8 = vsel %vm4226_vm6, %v519_v21, %v523_v9  ;;  %v542_v33 = vor.u32 %v541_v22, %v537_v3  ;;  %v563_v34 = vshrl.u32 %v4263_v1, 16  ;;  %v569_v35 = vshll.u32 %v4267_v14, 16  ;;  %v4309_v5 = vld [vmem:[#allocation2 + $0x50] sm:$0x1] }
  0x45   : > { %v3265_v36 = vcombine.low %v514_v20, %v524_v8  ;;  %v533_v37 = vrot.slane %v532_v27, 4  ;;  %v555_v38 = vrot.slane %v553_v30, 5  ;;  %v561_v39 = vrot.slane %v559_v31, 5  ;;  %v4319_v8 = vld [vmem:[#allocation2 + $0x58] sm:$0xf]  ;;  %p3875_p4 = pneg %p3874_p2 }
  0x46   : > { %v543_v40 = vrot.slane %v542_v33, 4  ;;  %v565_v41 = vrot.slane %v563_v34, 4  ;;  %v571_v42 = vrot.slane %v569_v35, 5  ;;  %v3283_v6 = vcombine.low %v433_v57, %v4263_v1 }
  0x47   : > { %3565 = vmatprep.mubr.msk.bf16.mxu0 %vm671_vm3, %v3265_v36  ;;  %v538_v47 = vsel %vm4226_vm6, %v533_v37, %v537_v3  ;;  %v556_v48 = vor.u32 %v555_v38, %v552_v29  ;;  %v574_v50 = vshrl.u32 %v435_v25, 16  ;;  %v577_v52 = vshll.u32 %v435_v25, 16 }
  0x48   : > { %v548_v56 = vsel %vm4226_vm6, %v543_v40, %v547_v23  ;;  %v566_v9 = vor.u32 %v565_v41, %v561_v39  ;;  %3587 = vmatprep.mubr.msk.bf16.mxu1 %vm671_vm3, %v3283_v6  ;;  %v583_v57 = vshll.u32 %v4280_v32, 16  ;;  %v587_v58 = vshrl.u32 %v4280_v32, 16  ;;  %v439_v23 = vld [vmem:[#allocation2 + $0x54] sm:$0xf]  ;;  %v4325_v40 = vld [vmem:[#allocation2 + $0x5c] sm:$0x1] }
  0x49   : > { %v3266_v60 = vcombine.low %v538_v47, %v548_v56  ;;  %v557_v61 = vrot.slane %v556_v48, 4  ;;  %v576_v62 = vrot.slane %v574_v50, 4  ;;  %v579_v63 = vrot.slane %v577_v52, 5  ;;  %v961_v48 = vld [vmem:[#allocation2] sm:$0xe] }
  0x4a   : > { %v567_v7 = vrot.slane %v566_v9, 4  ;;  %v585_v0 = vrot.slane %v583_v57, 5  ;;  %v589_v2 = vrot.slane %v587_v58, 4  ;;  %v593_v3 = vshll.u32 %v4295_v46, 16  ;;  %v412_v57 = vld [vmem:[%s4330_s12] sm:$0xf] }
  0x4b   : > { %3566 = vmatmul.mubr.msk.bf16.gmra.mxu0 %vm671_vm3, %v3266_v60  ;;  %v562_v18 = vsel %vm4226_vm6, %v557_v61, %v561_v39  ;;  %v580_v20 = vor.u32 %v579_v63, %v576_v62  ;;  %v3284_v21 = vcombine.low %v435_v25, %v4280_v32  ;;  %v598_v22 = vshrl.u32 %v437_v55, 16  ;;  %v413_v63 = vld [vmem:[%s4330_s12 + $0x4] sm:$0xf]  ;;  %419 = vst.msk [vmem:[#allocation2 + $0x60] sm:$0xf] %vm386_vm1, %v412_v57 }
  0x4c   : > { %v572_v27 = vsel %vm4226_vm6, %v567_v7, %v571_v42  ;;  %v590_v29 = vor.u32 %v589_v2, %v585_v0  ;;  %v595_v30 = vrot.slane %v593_v3, 5  ;;  %v601_v31 = vshll.u32 %v437_v55, 16  ;;  %v962_v3 = vld [vmem:[#allocation2 + $0xc] sm:$0xe]  ;;  %420 = vst.msk [vmem:[#allocation2 + $0x64] sm:$0xf] %vm386_vm1, %v413_v63 }
  0x4d   : > { %v3267_v33 = vcombine.low %v562_v18, %v572_v27  ;;  %v581_v34 = vrot.slane %v580_v20, 4  ;;  %3588 = vmatmul.mubr.msk.bf16.gmra.mxu1 %vm671_vm3, %v3284_v21  ;;  %v600_v35 = vrot.slane %v598_v22, 4  ;;  %v607_v36 = vshll.u32 %v4305_v59, 16  ;;  %v3847_v18 = vld [vmem:[#allocation2 + $0xc] sm:$0xff]  }
  0x4e   : > { %v591_v25 = vrot.slane %v590_v29, 4  ;;  %v603_v37 = vrot.slane %v601_v31, 5  ;;  %v611_v38 = vshrl.u32 %v4305_v59, 16  ;;  %v617_v39 = vshll.u32 %v4309_v5, 16  ;;  %v963_v29 = vld [vmem:[#allocation2 + $0x18] sm:$0xe] }
  0x4f   : > { %3569 = vmatprep.mubr.msk.bf16.mxu0 %vm671_vm3, %v3267_v33  ;;  %v586_v41 = vsel %vm4226_vm6, %v581_v34, %v585_v0  ;;  %v609_v42 = vrot.slane %v607_v36, 5  ;;  %v3285_v6 = vcombine.low %v437_v55, %v4305_v59  ;;  %v622_v47 = vshrl.u32 %v439_v23, 16  ;;  %v965_v57 = vld [vmem:[#allocation2 + $0x30] sm:$0xe] }
  0x50   : > { %v596_v50 = vsel %vm4226_vm6, %v591_v25, %v595_v30  ;;  %v604_v52 = vor.u32 %v603_v37, %v600_v35  ;;  %v613_v56 = vrot.slane %v611_v38, 4  ;;  %v619_v9 = vrot.slane %v617_v39, 5  ;;  %v3865_v35 = vld [vmem:[%s5160_s4 + $0x28] sm:$0xff]  }
  0x51   : > { %v3268_v58 = vcombine.low %v586_v41, %v596_v50  ;;  %3591 = vmatprep.mubr.msk.bf16.mxu1 %vm671_vm3, %v3285_v6  ;;  %v624_v60 = vrot.slane %v622_v47, 4  ;;  %v625_v61 = vshll.u32 %v439_v23, 16  ;;  %v631_v62 = vshll.u32 %v4319_v8, 16 }
  0x52   : > { %v605_v55 = vrot.slane %v604_v52, 4  ;;  %v614_v7 = vor.u32 %v613_v56, %v609_v42  ;;  %v635_v0 = vshrl.u32 %v4319_v8, 16  ;;  %v641_v2 = vshll.u32 %v4325_v40, 16 }
  0x53   : > { %3570 = vmatmul.mubr.msk.bf16.gmra.mxu0 %vm671_vm3, %v3268_v58  ;;  %v627_v20 = vrot.slane %v625_v61, 5  ;;  %v633_v21 = vrot.slane %v631_v62, 5  ;;  %v3286_v22 = vcombine.low %v439_v23, %v4319_v8  ;;  %v3295_v27 = vrot.slane %v961_v48, 9 }
  0x54   : > { %v610_v30 = vsel %vm4226_vm6, %v605_v55, %v609_v42  ;;  %v615_v31 = vrot.slane %v614_v7, 4  ;;  %v637_v33 = vrot.slane %v635_v0, 4  ;;  %v643_v34 = vrot.slane %v641_v2, 5  ;;  %v3849_v7 = vld [vmem:[#allocation2 + $0x24] sm:$0xff]  }
  0x55   : > { %v628_v36 = vor.u32 %v627_v20, %v624_v60  ;;  %3592 = vmatmul.mubr.msk.bf16.gmra.mxu1 %vm671_vm3, %v3286_v22  ;;  %v990_v25 = vrot.slane %v4204_v43, 5  ;;  %v3296_v23 = vrot.slane %v962_v3, 9  ;;  %v999_v37 = vrot.slane %v997_v19, 4  ;;  %v964_v43 = vld [vmem:[#allocation2 + $0x24] sm:$0xe] }
  0x56   : > { %v620_v38 = vsel %vm4226_vm6, %v615_v31, %v619_v9  ;;  %v638_v39 = vor.u32 %v637_v33, %v633_v21  ;;  %3615 = vmatprep.mubr.msk.bf16.mxu1 %vm671_vm3, %v3847_v18  ;;  %v3297_v41 = vrot.slane %v963_v29, 9  ;;  %v1004_v42 = vrot.slane %v4231_v24, 5  ;;  %v966_v60 = vld [vmem:[#allocation2 + $0x3c] sm:$0xe]  ;;  %v967_v3 = vld [vmem:[#allocation2 + $0x48] sm:$0xe] }
  0x57   : > { %v3269_v6 = vcombine.low %v610_v30, %v620_v38  ;;  %v629_v47 = vrot.slane %v628_v36, 4  ;;  %v991_v48 = vsel %vm4352_vm9, %v3295_v27, %v990_v25  ;;  %v992_v50 = vrot.slane %v990_v25, 4  ;;  %v968_v29 = vld [vmem:[#allocation2 + $0x54] sm:$0xe]  ;;  %v1409_v25 = vld [vmem:[#allocation2 + $0xc] sm:$0xf] }
  0x58   : > { %v639_v52 = vrot.slane %v638_v39, 4  ;;  %v4370_v56 = vsel %vm4352_vm9, %v3296_v23, %v997_v19  ;;  %v4376_v9 = vsel %vm4352_vm9, %v999_v37, %v1000_v26  ;;  %v4380_v24 = vsel %vm4352_vm9, %v3297_v41, %v1004_v42  ;;  %v3848_v26 = vld [vmem:[#allocation2 + $0x18] sm:$0xff]   ;;  %v4432_v39 = vld [vmem:[#allocation2 + $0x10] sm:$0xf] }
  0x59   : > { %3573 = vmatprep.mubr.msk.bf16.mxu0 %vm671_vm3, %v3269_v6  ;;  %v634_v53 = vsel %vm4226_vm6, %v629_v47, %v633_v21  ;;  %v994_v19 = vsel %vm4352_vm9, %v992_v50, %v993_v51  ;;  %v3305_v54 = vcombine.low %v4370_v56, %v4376_v9  ;;  %v1006_v58 = vrot.slane %v1004_v42, 4  ;;  %v3850_v41 = vld [vmem:[#allocation2 + $0x30] sm:$0xff]  }
  0x5a   : > { %v644_v61 = vsel %vm4226_vm6, %v639_v52, %v643_v34  ;;  %v3304_v62 = vcombine.low %v991_v48, %v994_v19  ;;  %v1007_v63 = vrot.slane %v4235_v28, 5  ;;  %v3298_v55 = vrot.slane %v964_v43, 9  ;;  %v1412_v43 = vld [vmem:[#allocation2 + $0x18] sm:$0xf]  ;;  %v3851_v52 = vld [vmem:[#allocation2 + $0x3c] sm:$0xff]  }
  0x5b   : > { %v3270_v0 = vcombine.low %v634_v53, %v644_v61  ;;  %v1011_v44 = vrot.slane %v4245_v45, 5  ;;  %v1014_v2 = vrot.slane %v4252_v49, 5  ;;  %v3299_v51 = vrot.slane %v965_v57, 9  ;;  %v4466_v61 = vld [vmem:[#allocation2 + $0x20] sm:$0x1] }
  0x5c   : > { %v1008_v18 = vsel %vm4352_vm9, %v1006_v58, %v1007_v63  ;;  %v1018_v20 = vrot.slane %v4263_v1, 5  ;;  %v1021_v21 = vrot.slane %v4267_v14, 5  ;;  %v3300_v22 = vrot.slane %v966_v60, 9 }
  0x5d   : > { %3574 = vmatmul.mubr.msk.bf16.gmra.mxu0 %vm671_vm3, %v3270_v0  ;;  %3616 = vmatmul.mubr.msk.bf16.vlgmr.msra.gmra.mxu1 %vm671_vm3, %v3848_v26  ;;  %v3306_v28 = vcombine.low %v4380_v24, %v1008_v18  ;;  %v4405_v45 = vsel %vm4352_vm9, %v3298_v55, %v1011_v44  ;;  %v1013_v49 = vrot.slane %v1011_v44, 4  ;;  %v1025_v27 = vrot.slane %v4280_v32, 5  ;;  %v4458_v26 = vld [vmem:[#allocation2 + $0x1c] sm:$0xf]  ;;  %v414_v0 = vld [vmem:[%s4330_s12 + $0x8] sm:$0x1] }
  0x5e   : > { %3597 = vmatprep.mubr.msk.bf16.mxu0 %vm671_vm3, %v3304_v62  ;;  %3619 = vmatprep.mubr.msk.bf16.mxu1 %vm671_vm3, %v3849_v7  ;;  %v4412_v1 = vsel %vm4352_vm9, %v3299_v51, %v1018_v20  ;;  %v1020_v14 = vrot.slane %v1018_v20, 4  ;;  %v1028_v30 = vrot.slane %v4295_v46, 5  ;;  %v3301_v31 = vrot.slane %v967_v3, 9  ;;  %421 = vst.msk [vmem:[#allocation2 + $0x68] sm:$0x1] %vm389_vm2, %v414_v0  ;;  %v3852_v51 = vld [vmem:[#allocation2 + $0x48] sm:$0xff]  }
  0x5f   : > { %v4417_v33 = vsel %vm4352_vm9, %v1013_v49, %v1014_v2  ;;  %v4421_v32 = vsel %vm4352_vm9, %v3300_v22, %v1025_v27  ;;  %v1027_v34 = vrot.slane %v1025_v27, 4  ;;  %v1032_v36 = vrot.slane %v4305_v59, 5  ;;  %3650 = vmatpush3.bf16.msra.mxu1 %v4131_v12 }
  0x60   : > { %v3307_v23 = vcombine.low %v4405_v45, %v4417_v33  ;;  %v4429_v46 = vsel %vm4352_vm9, %v1020_v14, %v1021_v21  ;;  %v1035_v37 = vrot.slane %v4309_v5, 5  ;;  %v3302_v38 = vrot.slane %v968_v29, 9  ;;  %3760 = vmatprep.subr.msk.bf16.mxu1 %vm696_vm0, %v4136_v13  ;;  %v4446_v5 = vld [vmem:[#allocation2 + $0x14] sm:$0x1]  ;;  %v1792_v21 = vld [vmem:[#allocation2 + $0x18] sm:$0xe] }
  0x61   : > { %v3308_v12 = vcombine.low %v4412_v1, %v4429_v46  ;;  %v4440_v59 = vsel %vm4352_vm9, %v1027_v34, %v1028_v30  ;;  %v4444_v42 = vsel %vm4352_vm9, %v3301_v31, %v1032_v36  ;;  %v1034_v6 = vrot.slane %v1032_v36, 4  ;;  %v1415_v29 = vld [vmem:[#allocation2 + $0x24] sm:$0xf]  ;;  %v4490_v36 = vld [vmem:[#allocation2 + $0x28] sm:$0xf] }
  0x62   : > { %v3309_v47 = vcombine.low %v4421_v32, %v4440_v59  ;;  %v1039_v13 = vrot.slane %v4319_v8, 5  ;;  %v1042_v48 = vrot.slane %v4325_v40, 5  ;;  %v1434_v50 = vshrl.u32 %v1409_v25, 16 }
  0x63   : > { %v4454_v24 = vsel %vm4352_vm9, %v1034_v6, %v1035_v37  ;;  %v1437_v57 = vshll.u32 %v1409_v25, 16  ;;  %v1443_v53 = vshll.u32 %v4432_v39, 16  ;;  %v1447_v19 = vshrl.u32 %v4432_v39, 16  ;;  %v3853_v25 = vld [vmem:[#allocation2 + $0x54] sm:$0xff]  }
  0x64   : > { %v3310_v8 = vcombine.low %v4444_v42, %v4454_v24  ;;  %v4464_v40 = vsel %vm4352_vm9, %v3302_v38, %v1039_v13  ;;  %v1041_v58 = vrot.slane %v1039_v13, 4  ;;  %v1436_v60 = vrot.slane %v1434_v50, 4 }
  0x65   : > { %3598 = vmatmul.mubr.msk.bf16.vlgmr.msra.gmra.mxu0 %vm671_vm3, %v3305_v54  ;;  %3620 = vmatmul.mubr.msk.bf16.gmra.mxu1 %vm671_vm3, %v3850_v41  ;;  %v1439_v62 = vrot.slane %v1437_v57, 5  ;;  %v1445_v63 = vrot.slane %v1443_v53, 5  ;;  %v1449_v55 = vrot.slane %v1447_v19, 4  ;;  %v1453_v7 = vshll.u32 %v4446_v5, 16  ;;  %v1791_v54 = vld [vmem:[#allocation2 + $0xc] sm:$0xe] }
  0x66   : > { %3632 = vmatpush3.bf16.msra.mxu0 %v4127_v11  ;;  %3601 = vmatprep.mubr.msk.bf16.mxu0 %vm671_vm3, %v3306_v28  ;;  %v4479_v44 = vsel %vm4352_vm9, %v1041_v58, %v1042_v48  ;;  %v1458_v2 = vshrl.u32 %v1412_v43, 16  ;;  %v1461_v56 = vshll.u32 %v1412_v43, 16  ;;  %v1467_v9 = vshll.u32 %v4458_v26, 16 }
  0x67   : > { %3623 = vmatprep.mubr.msk.bf16.mxu1 %vm671_vm3, %v3851_v52  ;;  %v3311_v3 = vcombine.low %v4464_v40, %v4479_v44  ;;  %v1440_v11 = vor.u32 %v1439_v62, %v1436_v60  ;;  %v1450_v18 = vor.u32 %v1449_v55, %v1445_v63  ;;  %v1455_v20 = vrot.slane %v1453_v7, 5  ;;  %3759 = vmatprep.subr.msk.bf16.mxu0 %vm696_vm0, %v4123_v10  ;;  %v1419_v55 = vld [vmem:[#allocation2 + $0x34] sm:$0xf] }
  0x68   : > { %v1460_v22 = vrot.slane %v1458_v2, 4  ;;  %v1463_v28 = vrot.slane %v1461_v56, 5  ;;  %v1469_v49 = vrot.slane %v1467_v9, 5  ;;  %v1471_v27 = vshrl.u32 %v4458_v26, 16  ;;  %v4527_v9 = vld [vmem:[#allocation2 + $0x38] sm:$0x1] }
  0x69   : > { %v1441_v14 = vrot.slane %v1440_v11, 4  ;;  %v1451_v30 = vrot.slane %v1450_v18, 4  ;;  %v1477_v31 = vshll.u32 %v4466_v61, 16  ;;  %v3354_v34 = vrot.slane %v1791_v54, 9 }
  0x6a   : > { %v1464_v37 = vor.u32 %v1463_v28, %v1460_v22  ;;  %v1473_v38 = vrot.slane %v1471_v27, 4  ;;  %v1825_v41 = vrot.slane %v4432_v39, 5  ;;  %v1828_v10 = vrot.slane %v4446_v5, 5 }
  0x6b   : > { %v1446_v6 = vsel %vm4226_vm6, %v1441_v14, %v1445_v63  ;;  %v1456_v13 = vsel %vm4226_vm6, %v1451_v30, %v1455_v20  ;;  %v1479_v48 = vrot.slane %v1477_v31, 5  ;;  %v3355_v50 = vrot.slane %v1792_v21, 9  ;;  %v1418_v63 = vld [vmem:[#allocation2 + $0x30] sm:$0xf] }
  0x6c   : > { %v4498_v43 = vcombine.low %v1446_v6, %v1456_v13  ;;  %v1465_v52 = vrot.slane %v1464_v37, 4  ;;  %v1474_v57 = vor.u32 %v1473_v38, %v1469_v49  ;;  %v1826_v53 = vsel %vm4352_vm9, %v3354_v34, %v1825_v41  ;;  %v1794_v38 = vld [vmem:[#allocation2 + $0x30] sm:$0xe] }
  0x6d   : > { %3602 = vmatmul.mubr.msk.bf16.gmra.mxu0 %vm671_vm3, %v3307_v23  ;;  %3624 = vmatmul.mubr.msk.bf16.gmra.mxu1 %vm671_vm3, %v3852_v51  ;;  %v1827_v39 = vrot.slane %v1825_v41, 4  ;;  %v1832_v5 = vrot.slane %v4458_v26, 5  ;;  %v1835_v19 = vrot.slane %v4466_v61, 5  ;;  %v1482_v58 = vshrl.u32 %v1415_v29, 16  ;;  %v4516_v23 = vld [vmem:[#allocation2 + $0x2c] sm:$0x1] }
  0x6e   : > { %3605 = vmatprep.mubr.msk.bf16.mxu0 %vm671_vm3, %v3308_v12  ;;  %3627 = vmatprep.mubr.msk.bf16.mxu1 %vm671_vm3, %v3853_v25  ;;  %v1470_v45 = vsel %vm4226_vm6, %v1465_v52, %v1469_v49  ;;  %v1475_v33 = vrot.slane %v1474_v57, 4  ;;  %v1485_v60 = vshll.u32 %v1415_v29, 16  ;;  %v1491_v62 = vshll.u32 %v4490_v36, 16  ;;  %v3854_v26 = vld [vmem:[#allocation2 + $0x60] sm:$0xff]  }
  0x6f   : > { %v1829_v61 = vsel %vm4352_vm9, %v1827_v39, %v1828_v10  ;;  %v4523_v1 = vsel %vm4352_vm9, %v3355_v50, %v1832_v5  ;;  %v1834_v46 = vrot.slane %v1832_v5, 4  ;;  %v1484_v12 = vrot.slane %v1482_v58, 4  ;;  %v1793_v49 = vld [vmem:[#allocation2 + $0x24] sm:$0xe]  ;;  %v4551_v5 = vld [vmem:[#allocation2 + $0x40] sm:$0xf] }
  0x70   : > { %v1480_v7 = vsel %vm4226_vm6, %v1475_v33, %v1479_v48  ;;  %v3363_v0 = vcombine.low %v1826_v53, %v1829_v61  ;;  %v1487_v2 = vrot.slane %v1485_v60, 5  ;;  %v1493_v56 = vrot.slane %v1491_v62, 5  ;;  %v4566_v61 = vld [vmem:[#allocation2 + $0x44] sm:$0x1] }
  0x71   : > { %v4529_v54 = vcombine.low %v1470_v45, %v1480_v7  ;;  %v1836_v51 = vsel %vm4352_vm9, %v1834_v46, %v1835_v19  ;;  %v1495_v11 = vshrl.u32 %v4490_v36, 16  ;;  %v1501_v18 = vshll.u32 %v4516_v23, 16  ;;  %v4570_v7 = vld [vmem:[#allocation2 + $0x4c] sm:$0xf] }
  0x72   : > { %v3364_v20 = vcombine.low %v4523_v1, %v1836_v51  ;;  %v1488_v21 = vor.u32 %v1487_v2, %v1484_v12  ;;  %v1506_v22 = vshrl.u32 %v1418_v63, 16  ;;  %v1509_v28 = vshll.u32 %v1418_v63, 16  ;;  %v1424_v1 = vld [vmem:[#allocation2 + $0x48] sm:$0xf]  ;;  %v4576_v51 = vld [vmem:[#allocation2 + $0x50] sm:$0x1] }
  0x73   : > { %v1497_v27 = vrot.slane %v1495_v11, 4  ;;  %v1503_v29 = vrot.slane %v1501_v18, 5  ;;  %v1515_v14 = vshll.u32 %v1419_v55, 16  ;;  %v1519_v30 = vshrl.u32 %v1419_v55, 16 }
  0x74   : > { %v1489_v31 = vrot.slane %v1488_v21, 4  ;;  %v1508_v34 = vrot.slane %v1506_v22, 4  ;;  %v1511_v25 = vrot.slane %v1509_v28, 5  ;;  %v1525_v37 = vshll.u32 %v4527_v9, 16  ;;  %v1795_v28 = vld [vmem:[#allocation2 + $0x3c] sm:$0xe] }
  0x75   : > { %3606 = vmatmul.mubr.msk.bf16.gmra.mxu0 %vm671_vm3, %v3309_v47  ;;  %3628 = vmatmul.mubr.msk.bf16.gmra.mxu1 %vm671_vm3, %v3854_v26  ;;  %v1498_v41 = vor.u32 %v1497_v27, %v1493_v56  ;;  %v1517_v10 = vrot.slane %v1515_v14, 5  ;;  %v1521_v6 = vrot.slane %v1519_v30, 4  ;;  %v3356_v13 = vrot.slane %v1793_v49, 9  ;;  %v1421_v47 = vld [vmem:[#allocation2 + $0x3c] sm:$0xf] }
  0x76   : > { %3609 = vmatprep.mubr.msk.bf16.mxu0 %vm671_vm3, %v3310_v8  ;;  %3651 = vmatprep.mubr.msk.bf16.mxu1 %vm671_vm3, %v3363_v0  ;;  %v1494_v48 = vsel %vm4226_vm6, %v1489_v31, %v1493_v56  ;;  %v1512_v50 = vor.u32 %v1511_v25, %v1508_v34  ;;  %v1527_v32 = vrot.slane %v1525_v37, 5  ;;  %v1839_v59 = vrot.slane %v4490_v36, 5  ;;  %v415_v25 = vld [vmem:[%s4330_s12 + $0xc] sm:$0xf]  ;;  %v416_v37 = vld [vmem:[%s4330_s12 + $0x10] sm:$0xf] }
  0x77   : > { %v1499_v52 = vrot.slane %v1498_v41, 4  ;;  %v1522_v57 = vor.u32 %v1521_v6, %v1517_v10  ;;  %v1842_v53 = vrot.slane %v4516_v23, 5  ;;  %v3357_v39 = vrot.slane %v1794_v38, 9  ;;  %422 = vst.msk [vmem:[#allocation2 + $0x6c] sm:$0xf] %vm386_vm1, %v415_v25 }
  0x78   : > { %v1513_v42 = vrot.slane %v1512_v50, 4  ;;  %v1840_v24 = vsel %vm4352_vm9, %v3356_v13, %v1839_v59  ;;  %v1841_v8 = vrot.slane %v1839_v59, 4  ;;  %v1846_v19 = vrot.slane %v1419_v55, 5  ;;  %v1796_v13 = vld [vmem:[#allocation2 + $0x48] sm:$0xe] }
  0x79   : > { %v1504_v58 = vsel %vm4226_vm6, %v1499_v52, %v1503_v29  ;;  %v1523_v45 = vrot.slane %v1522_v57, 4  ;;  %v1849_v36 = vrot.slane %v4527_v9, 5  ;;  %v1530_v33 = vshrl.u32 %v1421_v47, 16  ;;  %423 = vst.msk [vmem:[#allocation2 + $0x70] sm:$0xf] %vm386_vm1, %v416_v37 }
  0x7a   : > { %v4558_v60 = vcombine.low %v1494_v48, %v1504_v58  ;;  %v1518_v23 = vsel %vm4226_vm6, %v1513_v42, %v1517_v10  ;;  %v1843_v62 = vsel %vm4352_vm9, %v1841_v8, %v1842_v53  ;;  %v1847_v26 = vsel %vm4352_vm9, %v3357_v39, %v1846_v19  ;;  %v1427_v53 = vld [vmem:[#allocation2 + $0x54] sm:$0xf]  ;;  %v4605_v8 = vld [vmem:[#allocation2 + $0x58] sm:$0xf]  ;;  %v1798_v25 = vld [vmem:[#allocation2 + $0x60] sm:$0xe] }
  0x7b   : > { %v1528_v46 = vsel %vm4226_vm6, %v1523_v45, %v1527_v32  ;;  %v3365_v12 = vcombine.low %v1840_v24, %v1843_v62  ;;  %v1848_v63 = vrot.slane %v1846_v19, 4  ;;  %v1532_v55 = vrot.slane %v1530_v33, 4  ;;  %v417_v19 = vld [vmem:[%s4330_s12 + $0x14] sm:$0x1]  ;;  %v1430_v62 = vld [vmem:[#allocation2 + $0x60] sm:$0xf] }
  0x7c   : > { %v4572_v0 = vcombine.low %v1518_v23, %v1528_v46  ;;  %v1533_v2 = vshll.u32 %v1421_v47, 16  ;;  %v1539_v56 = vshll.u32 %v4551_v5, 16  ;;  %v1543_v9 = vshrl.u32 %v4551_v5, 16  ;;  %v4616_v23 = vld [vmem:[#allocation2 + $0x5c] sm:$0x1]  ;;  %s3966_s12 = smov [#allocation3]  }
  0x7d   : > { %3610 = vmatmul.mubr.msk.bf16.gmra.mxu0 %vm671_vm3, %v3311_v3  ;;  %3652 = vmatmul.mubr.msk.bf16.vlgmr.msra.gmra.mxu1 %vm671_vm3, %v3364_v20  ;;  %v1850_v11 = vsel %vm4352_vm9, %v1848_v63, %v1849_v36  ;;  %v1549_v18 = vshll.u32 %v4566_v61, 16  ;;  %v1554_v21 = vshrl.u32 %v1424_v1, 16  ;;  %v1557_v22 = vshll.u32 %v1424_v1, 16  ;;  %424 = vst.msk [vmem:[#allocation2 + $0x74] sm:$0x1] %vm389_vm2, %v417_v19  ;;  %s3876_s14 = sshll.u32 %s3966_s12, 4  ;;  %s3877_s14 = int_to_ptr.vmem [resolvable:$false] %s3876_s14 }
  0x7e   : > { %3633 = vmatprep.mubr.msk.bf16.mxu0 %vm671_vm3, %v4498_v43  ;;  %3655 = vmatprep.mubr.msk.bf16.mxu1 %vm671_vm3, %v3365_v12  ;;  %v3366_v40 = vcombine.low %v1847_v26, %v1850_v11  ;;  %v1535_v44 = vrot.slane %v1533_v2, 5  ;;  %v1541_v3 = vrot.slane %v1539_v56, 5  ;;  %v1545_v49 = vrot.slane %v1543_v9, 4  ;;  %v1431_v46 = vld [vmem:[#allocation2 + $0x64] sm:$0xf]  ;;  %s3878_s16 = scalar_lea.vmem %s3877_s14, 512  ;;  %p3879_p5 = scmp.lt.s32.totalorder %s5098_s20, %s3877_s14 }
  0x7f   : > { %v1551_v20 = vrot.slane %v1549_v18, 5  ;;  %v1556_v27 = vrot.slane %v1554_v21, 4  ;;  %v1559_v29 = vrot.slane %v1557_v22, 5  ;;  %v1563_v14 = vshll.u32 %v4570_v7, 16  ;;  %3686 = vmatpush3.bf16.msra.mxu1 %v4149_v16  ;;  %v1797_v2 = vld [vmem:[#allocation2 + $0x54] sm:$0xe]  ;;  %p3880_p6 = scmp.lt.s32.totalorder %s3878_s16, %s3872_s24 }
  0x80   : > { %v1536_v30 = vor.u32 %v1535_v44, %v1532_v55  ;;  %v1546_v31 = vor.u32 %v1545_v49, %v1541_v3  ;;  %v1567_v34 = vshrl.u32 %v4570_v7, 16  ;;  %v1573_v43 = vshll.u32 %v4576_v51, 16 }
  0x81   : > { %v1560_v38 = vor.u32 %v1559_v29, %v1556_v27  ;;  %v1565_v41 = vrot.slane %v1563_v14, 5  ;;  %v3358_v10 = vrot.slane %v1795_v28, 9  ;;  %v1853_v6 = vrot.slane %v4551_v5, 5  ;;  %v1432_v28 = vld [vmem:[#allocation2 + $0x68] sm:$0x1]  ;;  %p3881_p7 = por %p3880_p6, %p3879_p5 }
  0x82   : > { %v1537_v16 = vrot.slane %v1536_v30, 4  ;;  %v1547_v48 = vrot.slane %v1546_v31, 4  ;;  %v1569_v50 = vrot.slane %v1567_v34, 4  ;;  %v1575_v32 = vrot.slane %v1573_v43, 5 }
  0x83   : > { %v1561_v59 = vrot.slane %v1560_v38, 4  ;;  %v1854_v47 = vsel %vm4352_vm9, %v3358_v10, %v1853_v6  ;;  %v1855_v52 = vrot.slane %v1853_v6, 4  ;;  %v1856_v57 = vrot.slane %v4566_v61, 5  ;;  %p3882_p9 = pnand %p3881_p7, %p3875_p4 }
  0x84   : > { %v1542_v39 = vsel %vm4226_vm6, %v1537_v16, %v1541_v3  ;;  %v1552_v5 = vsel %vm4226_vm6, %v1547_v48, %v1551_v20  ;;  %v1570_v42 = vor.u32 %v1569_v50, %v1565_v41  ;;  %v3359_v24 = vrot.slane %v1796_v13, 9  ;;  %v2244_v50 = vld [vmem:[#allocation2 + $0x18] sm:$0xf] }
  0x85   : > { %3634 = vmatmul.mubr.msk.bf16.vlgmr.msra.gmra.mxu0 %vm671_vm3, %v4529_v54  ;;  %3656 = vmatmul.mubr.msk.bf16.gmra.mxu1 %vm671_vm3, %v3366_v40  ;;  %v3342_v58 = vcombine.low %v1542_v39, %v1552_v5  ;;  %v1566_v45 = vsel %vm4226_vm6, %v1561_v59, %v1565_v41  ;;  %v1857_v36 = vsel %vm4352_vm9, %v1855_v52, %v1856_v57  ;;  %v1860_v33 = vrot.slane %v4570_v7, 5  ;;  %v4645_v52 = vld [vmem:[#allocation2 + $0x1c] sm:$0xf] }
  0x86   : > { %3668 = vmatpush3.bf16.msra.mxu0 %v4145_v15  ;;  %3637 = vmatprep.mubr.msk.bf16.mxu0 %vm671_vm3, %v4558_v60  ;;  %v1571_v54 = vrot.slane %v1570_v42, 4  ;;  %v3367_v26 = vcombine.low %v1854_v47, %v1857_v36  ;;  %v1863_v61 = vrot.slane %v4576_v51, 5  ;;  %v1578_v1 = vshrl.u32 %v1427_v53, 16  ;;  %v3871_v15 = vld [vmem:[%s5158_s2 + $0x20] sm:$0xf] }
  0x87   : > { %v1861_v12 = vsel %vm4352_vm9, %v3359_v24, %v1860_v33  ;;  %v1862_v63 = vrot.slane %v1860_v33, 4  ;;  %v1581_v55 = vshll.u32 %v1427_v53, 16  ;;  %v1587_v7 = vshll.u32 %v4605_v8, 16  ;;  %3761 = vmatprep.subr.msk.bf16.mxu0 %vm696_vm0, %v3871_v15  ;;  %v4651_v42 = vld [vmem:[#allocation2 + $0x20] sm:$0x1] }
  0x88   : > { %v1576_v60 = vsel %vm4226_vm6, %v1571_v54, %v1575_v32  ;;  %3659 = vmatprep.mubr.msk.bf16.mxu1 %vm671_vm3, %v3367_v26  ;;  %v1580_v56 = vrot.slane %v1578_v1, 4  ;;  %v1591_v9 = vshrl.u32 %v4605_v8, 16  ;;  %v1597_v51 = vshll.u32 %v4616_v23, 16  ;;  %v4653_v36 = vld [vmem:[#allocation2 + $0x28] sm:$0xf] }
  0x89   : > { %v3343_v11 = vcombine.low %v1566_v45, %v1576_v60  ;;  %v1864_v18 = vsel %vm4352_vm9, %v1862_v63, %v1863_v61  ;;  %v1583_v21 = vrot.slane %v1581_v55, 5  ;;  %v1589_v22 = vrot.slane %v1587_v7, 5  ;;  %v2247_v45 = vld [vmem:[#allocation2 + $0x24] sm:$0xf] }
  0x8a   : > { %v3368_v40 = vcombine.low %v1861_v12, %v1864_v18  ;;  %v1593_v44 = vrot.slane %v1591_v9, 4  ;;  %v1599_v3 = vrot.slane %v1597_v51, 5  ;;  %v1602_v49 = vshrl.u32 %v1430_v62, 16  ;;  %v4670_v9 = vld [vmem:[#allocation2 + $0x2c] sm:$0x1] }
  0x8b   : > { %v1584_v20 = vor.u32 %v1583_v21, %v1580_v56  ;;  %v1605_v27 = vshll.u32 %v1430_v62, 16  ;;  %v1611_v29 = vshll.u32 %v1431_v46, 16  ;;  %v1615_v14 = vshrl.u32 %v1431_v46, 16 }
  0x8c   : > { %v1594_v30 = vor.u32 %v1593_v44, %v1589_v22  ;;  %v1604_v31 = vrot.slane %v1602_v49, 4  ;;  %v1621_v34 = vshll.u32 %v1432_v28, 16  ;;  %v3360_v43 = vrot.slane %v1797_v2, 9  ;;  %v4676_v49 = vld [vmem:[#allocation2 + $0x34] sm:$0xf] }
  0x8d   : > { %3638 = vmatmul.mubr.msk.bf16.gmra.mxu0 %vm671_vm3, %v4572_v0  ;;  %3660 = vmatmul.mubr.msk.bf16.gmra.mxu1 %vm671_vm3, %v3368_v40  ;;  %v1585_v37 = vrot.slane %v1584_v20, 4  ;;  %v1607_v38 = vrot.slane %v1605_v27, 5  ;;  %v1613_v41 = vrot.slane %v1611_v29, 5  ;;  %v1617_v10 = vrot.slane %v1615_v14, 4 }
  0x8e   : > { %3641 = vmatprep.mubr.msk.bf16.mxu0 %vm671_vm3, %v3342_v58  ;;  %v1595_v6 = vrot.slane %v1594_v30, 4  ;;  %v1623_v13 = vrot.slane %v1621_v34, 5  ;;  %v1867_v16 = vrot.slane %v4605_v8, 5  ;;  %v1870_v48 = vrot.slane %v4616_v23, 5 }
  0x8f   : > { %v1590_v32 = vsel %vm4226_vm6, %v1585_v37, %v1589_v22  ;;  %v1608_v59 = vor.u32 %v1607_v38, %v1604_v31  ;;  %v1618_v0 = vor.u32 %v1617_v10, %v1613_v41  ;;  %v3361_v47 = vrot.slane %v1798_v25, 9  ;;  %v3855_v37 = vld [vmem:[#allocation2 + $0x18] sm:$0xff]  }
  0x90   : > { %v1600_v57 = vsel %vm4226_vm6, %v1595_v6, %v1599_v3  ;;  %v1868_v53 = vsel %vm4352_vm9, %v3360_v43, %v1867_v16  ;;  %v1869_v39 = vrot.slane %v1867_v16, 4  ;;  %v1874_v5 = vrot.slane %v1431_v46, 5  ;;  %v4679_v43 = vld [vmem:[#allocation2 + $0x38] sm:$0x1] }
  0x91   : > { %v3344_v24 = vcombine.low %v1590_v32, %v1600_v57  ;;  %v1609_v8 = vrot.slane %v1608_v59, 4  ;;  %v1619_v19 = vrot.slane %v1618_v0, 4  ;;  %v1877_v58 = vrot.slane %v1432_v28, 5  ;;  %v2250_v28 = vld [vmem:[#allocation2 + $0x30] sm:$0xf] }
  0x92   : > { %v1871_v33 = vsel %vm4352_vm9, %v1869_v39, %v1870_v48  ;;  %v1875_v23 = vsel %vm4352_vm9, %v3361_v47, %v1874_v5  ;;  %v1876_v62 = vrot.slane %v1874_v5, 4  ;;  %v2269_v54 = vshrl.u32 %v2244_v50, 16 }
  0x93   : > { %v1614_v26 = vsel %vm4226_vm6, %v1609_v8, %v1613_v41  ;;  %v1624_v61 = vsel %vm4226_vm6, %v1619_v19, %v1623_v13  ;;  %v3369_v1 = vcombine.low %v1868_v53, %v1871_v33  ;;  %v2272_v46 = vshll.u32 %v2244_v50, 16  ;;  %v2253_v13 = vld [vmem:[#allocation2 + $0x3c] sm:$0xf] }
  0x94   : > { %v3345_v12 = vcombine.low %v1614_v26, %v1624_v61  ;;  %v1878_v63 = vsel %vm4352_vm9, %v1876_v62, %v1877_v58  ;;  %v2271_v55 = vrot.slane %v2269_v54, 4  ;;  %v2278_v7 = vshll.u32 %v4645_v52, 16  ;;  %v2256_v62 = vld [vmem:[#allocation2 + $0x48] sm:$0xf] }
  0x95   : > { %3642 = vmatmul.mubr.msk.bf16.gmra.mxu0 %vm671_vm3, %v3343_v11  ;;  %3663 = vmatprep.mubr.msk.bf16.mxu1 %vm671_vm3, %v3369_v1  ;;  %v3370_v2 = vcombine.low %v1875_v23, %v1878_v63  ;;  %v2274_v15 = vrot.slane %v2272_v46, 5  ;;  %v2282_v60 = vshrl.u32 %v4645_v52, 16  ;;  %v2288_v56 = vshll.u32 %v4651_v42, 16  ;;  %v4694_v23 = vld [vmem:[#allocation2 + $0x44] sm:$0x1] }
  0x96   : > { %3645 = vmatprep.mubr.msk.bf16.mxu0 %vm671_vm3, %v3344_v24  ;;  %v2280_v51 = vrot.slane %v2278_v7, 5  ;;  %v2293_v18 = vshrl.u32 %v2247_v45, 16  ;;  %v2296_v21 = vshll.u32 %v2247_v45, 16  ;;  %v2302_v22 = vshll.u32 %v4653_v36, 16  ;;  %v4689_v24 = vld [vmem:[#allocation2 + $0x40] sm:$0xf] }
  0x97   : > { %3664 = vmatmul.mubr.msk.bf16.gmra.mxu1 %vm671_vm3, %v3370_v2  ;;  %v2275_v11 = vor.u32 %v2274_v15, %v2271_v55  ;;  %v2284_v40 = vrot.slane %v2282_v60, 4  ;;  %v2290_v44 = vrot.slane %v2288_v56, 5  ;;  %v2306_v3 = vshrl.u32 %v4653_v36, 16  ;;  %v3856_v46 = vld [vmem:[#allocation2 + $0x24] sm:$0xff]   ;;  %v4702_v56 = vld [vmem:[#allocation2 + $0x4c] sm:$0xf] }
  0x98   : > { %v2295_v20 = vrot.slane %v2293_v18, 4  ;;  %v2298_v27 = vrot.slane %v2296_v21, 5  ;;  %v2304_v29 = vrot.slane %v2302_v22, 5  ;;  %v2312_v14 = vshll.u32 %v4670_v9, 16  ;;  %v3857_v18 = vld [vmem:[#allocation2 + $0x30] sm:$0xff]  }
  0x99   : > { %v2276_v30 = vrot.slane %v2275_v11, 4  ;;  %v2285_v31 = vor.u32 %v2284_v40, %v2280_v51  ;;  %v2308_v34 = vrot.slane %v2306_v3, 4  ;;  %v2317_v25 = vshrl.u32 %v2250_v28, 16  ;;  %v4707_v11 = vld [vmem:[#allocation2 + $0x50] sm:$0x1] }
  0x9a   : > { %v2299_v38 = vor.u32 %v2298_v27, %v2295_v20  ;;  %v2314_v41 = vrot.slane %v2312_v14, 5  ;;  %v2320_v10 = vshll.u32 %v2250_v28, 16  ;;  %v2326_v6 = vshll.u32 %v4676_v49, 16 }
  0x9b   : > { %v2281_v16 = vsel %vm4226_vm6, %v2276_v30, %v2280_v51  ;;  %v2286_v48 = vrot.slane %v2285_v31, 4  ;;  %v2309_v50 = vor.u32 %v2308_v34, %v2304_v29  ;;  %v2319_v32 = vrot.slane %v2317_v25, 4 }
  0x9c   : > { %v2300_v59 = vrot.slane %v2299_v38, 4  ;;  %v2322_v0 = vrot.slane %v2320_v10, 5  ;;  %v2328_v47 = vrot.slane %v2326_v6, 5  ;;  %v2330_v57 = vshrl.u32 %v4676_v49, 16  ;;  %v4715_v10 = vld [vmem:[#allocation2 + $0x58] sm:$0xf] }
  0x9d   : > { %3646 = vmatmul.mubr.msk.bf16.gmra.mxu0 %vm671_vm3, %v3345_v12  ;;  %v2291_v53 = vsel %vm4226_vm6, %v2286_v48, %v2290_v44  ;;  %v2310_v39 = vrot.slane %v2309_v50, 4  ;;  %v2336_v5 = vshll.u32 %v4679_v43, 16  ;;  %v2341_v8 = vshrl.u32 %v2253_v13, 16  ;;  %v4719_v48 = vld [vmem:[#allocation2 + $0x5c] sm:$0x1] }
  0x9e   : > { %3669 = vmatprep.mubr.msk.bf16.mxu0 %vm671_vm3, %v3855_v37  ;;  %v3397_v19 = vcombine.low %v2281_v16, %v2291_v53  ;;  %v2305_v58 = vsel %vm4226_vm6, %v2300_v59, %v2304_v29  ;;  %v2323_v45 = vor.u32 %v2322_v0, %v2319_v32  ;;  %v2332_v33 = vrot.slane %v2330_v57, 4  ;;  %v2259_v29 = vld [vmem:[#allocation2 + $0x54] sm:$0xf] }
  0x9f   : > { %v2315_v54 = vsel %vm4226_vm6, %v2310_v39, %v2314_v41  ;;  %v2338_v26 = vrot.slane %v2336_v5, 5  ;;  %v2343_v61 = vrot.slane %v2341_v8, 4  ;;  %v2344_v1 = vshll.u32 %v2253_v13, 16  ;;  %v2262_v5 = vld [vmem:[#allocation2 + $0x60] sm:$0xf] }
  0xa0   : > { %3687 = vmatprep.mubr.msk.bf16.mxu1 %vm671_vm3, %v3397_v19  ;;  %v3398_v12 = vcombine.low %v2305_v58, %v2315_v54  ;;  %v2324_v63 = vrot.slane %v2323_v45, 4  ;;  %v2333_v55 = vor.u32 %v2332_v33, %v2328_v47  ;;  %v2350_v7 = vshll.u32 %v4689_v24, 16  ;;  %v3858_v8 = vld [vmem:[#allocation2 + $0x3c] sm:$0xff]  }
  0xa1   : > { %v2346_v2 = vrot.slane %v2344_v1, 5  ;;  %v2354_v15 = vshrl.u32 %v4689_v24, 16  ;;  %v2360_v60 = vshll.u32 %v4694_v23, 16  ;;  %v2365_v51 = vshrl.u32 %v2256_v62, 16 }
  0xa2   : > { %3688 = vmatmul.mubr.msk.bf16.vlgmr.msra.gmra.mxu1 %vm671_vm3, %v3398_v12  ;;  %v2329_v21 = vsel %vm4226_vm6, %v2324_v63, %v2328_v47  ;;  %v2334_v22 = vrot.slane %v2333_v55, 4  ;;  %v2352_v28 = vrot.slane %v2350_v7, 5  ;;  %v2368_v40 = vshll.u32 %v2256_v62, 16  ;;  %v4729_v62 = vld [vmem:[#allocation2 + $0x64] sm:$0xf] }
  0xa3   : > { %v2347_v44 = vor.u32 %v2346_v2, %v2343_v61  ;;  %v2356_v3 = vrot.slane %v2354_v15, 4  ;;  %v2362_v20 = vrot.slane %v2360_v60, 5  ;;  %v2367_v27 = vrot.slane %v2365_v51, 4  ;;  %v4733_v7 = vld [vmem:[#allocation2 + $0x68] sm:$0x1] }
  0xa4   : > { %v2339_v14 = vsel %vm4226_vm6, %v2334_v22, %v2338_v26  ;;  %v2370_v30 = vrot.slane %v2368_v40, 5  ;;  %v2374_v31 = vshll.u32 %v4702_v56, 16  ;;  %v2378_v34 = vshrl.u32 %v4702_v56, 16  ;;  %v3859_v26 = vld [vmem:[#allocation2 + $0x48] sm:$0xff]  }
  0xa5   : > { %3670 = vmatmul.mubr.msk.bf16.vlgmr.msra.gmra.mxu0 %vm671_vm3, %v3856_v46  ;;  %v3399_v25 = vcombine.low %v2329_v21, %v2339_v14  ;;  %v2348_v37 = vrot.slane %v2347_v44, 4  ;;  %v2357_v38 = vor.u32 %v2356_v3, %v2352_v28  ;;  %v2384_v41 = vshll.u32 %v4707_v11, 16  ;;  %v2265_v21 = vld [vmem:[#allocation2 + $0x6c] sm:$0xf]  ;;  %v4741_v3 = vld [vmem:[#allocation2 + $0x70] sm:$0xf] }
  0xa6   : > { %3704 = vmatpush3.bf16.msra.mxu0 %v4152_v17  ;;  %3673 = vmatprep.mubr.msk.bf16.mxu0 %vm671_vm3, %v3857_v18  ;;  %v2371_v6 = vor.u32 %v2370_v30, %v2367_v27  ;;  %v2376_v13 = vrot.slane %v2374_v31, 5  ;;  %v2380_v16 = vrot.slane %v2378_v34, 4  ;;  %v2389_v50 = vshrl.u32 %v2259_v29, 16 }
  0xa7   : > { %3691 = vmatprep.mubr.msk.bf16.mxu1 %vm671_vm3, %v3399_v25  ;;  %v2353_v32 = vsel %vm4226_vm6, %v2348_v37, %v2352_v28  ;;  %v2358_v59 = vrot.slane %v2357_v38, 4  ;;  %v2386_v0 = vrot.slane %v2384_v41, 5  ;;  %v2392_v47 = vshll.u32 %v2259_v29, 16 }
  0xa8   : > { %v2372_v57 = vrot.slane %v2371_v6, 4  ;;  %v2381_v53 = vor.u32 %v2380_v16, %v2376_v13  ;;  %v2391_v39 = vrot.slane %v2389_v50, 4  ;;  %v2398_v17 = vshll.u32 %v4715_v10, 16  ;;  %v4748_v6 = vld [vmem:[#allocation2 + $0x74] sm:$0x1] }
  0xa9   : > { %v2363_v19 = vsel %vm4226_vm6, %v2358_v59, %v2362_v20  ;;  %v2394_v58 = vrot.slane %v2392_v47, 5  ;;  %v2402_v45 = vshrl.u32 %v4715_v10, 16  ;;  %v2408_v33 = vshll.u32 %v4719_v48, 16  ;;  %v2626_v16 = vld [vmem:[#allocation2 + $0x18] sm:$0xe] }
  0xaa   : > { %v3400_v54 = vcombine.low %v2353_v32, %v2363_v19  ;;  %v2377_v61 = vsel %vm4226_vm6, %v2372_v57, %v2376_v13  ;;  %v2382_v1 = vrot.slane %v2381_v53, 4  ;;  %v2400_v46 = vrot.slane %v2398_v17, 5  ;;  %v3860_v50 = vld [vmem:[#allocation2 + $0x54] sm:$0xff]   ;;  %v3861_v53 = vld [vmem:[#allocation2 + $0x60] sm:$0xff]  }
  0xab   : > { %v2395_v12 = vor.u32 %v2394_v58, %v2391_v39  ;;  %v2404_v63 = vrot.slane %v2402_v45, 4  ;;  %v2410_v55 = vrot.slane %v2408_v33, 5  ;;  %v2413_v2 = vshrl.u32 %v2262_v5, 16 }
  0xac   : > { %3692 = vmatmul.mubr.msk.bf16.gmra.mxu1 %vm671_vm3, %v3400_v54  ;;  %v2387_v15 = vsel %vm4226_vm6, %v2382_v1, %v2386_v0  ;;  %v2416_v60 = vshll.u32 %v2262_v5, 16  ;;  %v2422_v51 = vshll.u32 %v4729_v62, 16  ;;  %v2426_v18 = vshrl.u32 %v4729_v62, 16 }
  0xad   : > { %3674 = vmatmul.mubr.msk.bf16.gmra.mxu0 %vm671_vm3, %v3858_v8  ;;  %v3401_v22 = vcombine.low %v2377_v61, %v2387_v15  ;;  %v2396_v28 = vrot.slane %v2395_v12, 4  ;;  %v2405_v40 = vor.u32 %v2404_v63, %v2400_v46  ;;  %v2415_v44 = vrot.slane %v2413_v2, 4  ;;  %v2627_v2 = vld [vmem:[#allocation2 + $0x24] sm:$0xe] }
  0xae   : > { %3677 = vmatprep.mubr.msk.bf16.mxu0 %vm671_vm3, %v3859_v26  ;;  %v2418_v20 = vrot.slane %v2416_v60, 5  ;;  %v2424_v27 = vrot.slane %v2422_v51, 5  ;;  %v2428_v29 = vrot.slane %v2426_v18, 4  ;;  %v2432_v14 = vshll.u32 %v4733_v7, 16  ;;  %v2628_v18 = vld [vmem:[#allocation2 + $0x30] sm:$0xe] }
  0xaf   : > { %3695 = vmatprep.mubr.msk.bf16.mxu1 %vm671_vm3, %v3401_v22  ;;  %v2401_v30 = vsel %vm4226_vm6, %v2396_v28, %v2400_v46  ;;  %v2406_v31 = vrot.slane %v2405_v40, 4  ;;  %v2437_v34 = vshrl.u32 %v2265_v21, 16  ;;  %v2440_v25 = vshll.u32 %v2265_v21, 16  ;;  %v3862_v22 = vld [vmem:[#allocation2 + $0x6c] sm:$0xff]  }
  0xb0   : > { %v2419_v37 = vor.u32 %v2418_v20, %v2415_v44  ;;  %v2429_v38 = vor.u32 %v2428_v29, %v2424_v27  ;;  %v2434_v41 = vrot.slane %v2432_v14, 5  ;;  %v2446_v13 = vshll.u32 %v4741_v3, 16 }
  0xb1   : > { %v2411_v32 = vsel %vm4226_vm6, %v2406_v31, %v2410_v55  ;;  %v2439_v59 = vrot.slane %v2437_v34, 4  ;;  %v2442_v0 = vrot.slane %v2440_v25, 5  ;;  %v2450_v47 = vshrl.u32 %v4741_v3, 16  ;;  %v2629_v34 = vld [vmem:[#allocation2 + $0x3c] sm:$0xe] }
  0xb2   : > { %v3402_v57 = vcombine.low %v2401_v30, %v2411_v32  ;;  %v2420_v39 = vrot.slane %v2419_v37, 4  ;;  %v2430_v17 = vrot.slane %v2429_v38, 4  ;;  %v2448_v5 = vrot.slane %v2446_v13, 5  ;;  %v2630_v37 = vld [vmem:[#allocation2 + $0x48] sm:$0xe] }
  0xb3   : > { %v2443_v8 = vor.u32 %v2442_v0, %v2439_v59  ;;  %v2452_v19 = vrot.slane %v2450_v47, 4  ;;  %v2456_v58 = vshll.u32 %v4748_v6, 16  ;;  %v3413_v45 = vrot.slane %v2626_v16, 9 }
  0xb4   : > { %3696 = vmatmul.mubr.msk.bf16.gmra.mxu1 %vm671_vm3, %v3402_v57  ;;  %v2425_v33 = vsel %vm4226_vm6, %v2420_v39, %v2424_v27  ;;  %v2435_v54 = vsel %vm4226_vm6, %v2430_v17, %v2434_v41  ;;  %v2660_v26 = vrot.slane %v4645_v52, 5  ;;  %v2663_v61 = vrot.slane %v4651_v42, 5  ;;  %v2632_v39 = vld [vmem:[#allocation2 + $0x60] sm:$0xe] }
  0xb5   : > { %3678 = vmatmul.mubr.msk.bf16.gmra.mxu0 %vm671_vm3, %v3860_v50  ;;  %v3403_v1 = vcombine.low %v2425_v33, %v2435_v54  ;;  %v2444_v46 = vrot.slane %v2443_v8, 4  ;;  %v2453_v12 = vor.u32 %v2452_v19, %v2448_v5  ;;  %v2458_v63 = vrot.slane %v2456_v58, 5 }
  0xb6   : > { %3681 = vmatprep.mubr.msk.bf16.mxu0 %vm671_vm3, %v3861_v53  ;;  %v2662_v55 = vrot.slane %v2660_v26, 4  ;;  %v2667_v15 = vrot.slane %v4653_v36, 5  ;;  %v2661_v42 = vsel %vm4352_vm9, %v3413_v45, %v2660_v26  ;;  %v2674_v21 = vrot.slane %v4676_v49, 5  ;;  %v2631_v53 = vld [vmem:[#allocation2 + $0x54] sm:$0xe] }
  0xb7   : > { %3699 = vmatprep.mubr.msk.bf16.mxu1 %vm671_vm3, %v3403_v1  ;;  %v2449_v60 = vsel %vm4226_vm6, %v2444_v46, %v2448_v5  ;;  %v2454_v52 = vrot.slane %v2453_v12, 4  ;;  %v3414_v36 = vrot.slane %v2627_v2, 9  ;;  %v2670_v27 = vrot.slane %v4670_v9, 5  ;;  %v2633_v1 = vld [vmem:[#allocation2 + $0x6c] sm:$0xe] }
  0xb8   : > { %v2664_v51 = vsel %vm4352_vm9, %v2662_v55, %v2663_v61  ;;  %v2669_v20 = vrot.slane %v2667_v15, 4  ;;  %v3415_v29 = vrot.slane %v2628_v18, 9  ;;  %v2676_v14 = vrot.slane %v2674_v21, 4  ;;  %v3866_v18 = vld [vmem:[%s5160_s4 + $0x20] sm:$0xff]  }
  0xb9   : > { %v2459_v28 = vsel %vm4226_vm6, %v2454_v52, %v2458_v63  ;;  %v3422_v44 = vcombine.low %v2661_v42, %v2664_v51  ;;  %v2677_v30 = vrot.slane %v4679_v43, 5  ;;  %v2668_v4 = vsel %vm4352_vm9, %v3414_v36, %v2667_v15 }
  0xba   : > { %v3404_v40 = vcombine.low %v2449_v60, %v2459_v28  ;;  %v2671_v49 = vsel %vm4352_vm9, %v2669_v20, %v2670_v27  ;;  %v2681_v31 = vrot.slane %v4689_v24, 5  ;;  %v2675_v9 = vsel %vm4352_vm9, %v3415_v29, %v2674_v21  ;;  %v3863_v60 = vld [vmem:[%s5160_s4 + $0x38] sm:$0xff]  }
  0xbb   : > { %v2678_v43 = vsel %vm4352_vm9, %v2676_v14, %v2677_v30  ;;  %v2688_v25 = vrot.slane %v4702_v56, 5  ;;  %v3423_v38 = vcombine.low %v2668_v4, %v2671_v49  ;;  %v3416_v13 = vrot.slane %v2629_v34, 9  ;;  %3721 = vmatprep.subr.bf16.mxu1 %v3863_v60  ;;  %v3868_v49 = vld [vmem:[%s5160_s4 + $0x10] sm:$0xff]   ;;  %v3869_v34 = vld [vmem:[%s5160_s4 + $0x8] sm:$0xff]  }
  0xbc   : > { %3700 = vmatmul.mubr.msk.bf16.gmra.mxu1 %vm671_vm3, %v3404_v40  ;;  %v3424_v41 = vcombine.low %v2675_v9, %v2678_v43  ;;  %v2683_v16 = vrot.slane %v2681_v31, 4  ;;  %v2684_v50 = vrot.slane %v4694_v23, 5  ;;  %v3417_v32 = vrot.slane %v2630_v37, 9 }
  0xbd   : > { %3682 = vmatmul.mubr.msk.bf16.gmra.mxu0 %vm671_vm3, %v3862_v22  ;;  %v2690_v59 = vrot.slane %v2688_v25, 4  ;;  %v2691_v24 = vrot.slane %v4707_v11, 5  ;;  %v2682_v0 = vsel %vm4352_vm9, %v3416_v13, %v2681_v31  ;;  %v2695_v47 = vrot.slane %v4715_v10, 5  ;;  %3722 = vmatpush3.bf16.msra.mxu1 %v3863_v60 }
  0xbe   : > { %3705 = vmatprep.mubr.msk.bf16.mxu0 %vm671_vm3, %v3422_v44  ;;  %v2685_v56 = vsel %vm4352_vm9, %v2683_v16, %v2684_v50  ;;  %v2689_v57 = vsel %vm4352_vm9, %v3417_v32, %v2688_v25  ;;  %v2702_v11 = vrot.slane %v4729_v62, 5  ;;  %v3418_v8 = vrot.slane %v2631_v53, 9  ;;  %v3867_v44 = vld [vmem:[%s5160_s4 + $0x18] sm:$0xff]   ;;  %v3870_v50 = vld [vmem:[%s5160_s4] sm:$0xff]  }
  0xbf   : > { %v2692_v23 = vsel %vm4352_vm9, %v2690_v59, %v2691_v24  ;;  %v3425_v17 = vcombine.low %v2682_v0, %v2685_v56  ;;  %v2697_v19 = vrot.slane %v2695_v47, 4  ;;  %v2698_v58 = vrot.slane %v4719_v48, 5 }
  0xc0   : > { %v3426_v5 = vcombine.low %v2689_v57, %v2692_v23  ;;  %v3419_v45 = vrot.slane %v2632_v39, 9  ;;  %v2704_v33 = vrot.slane %v2702_v11, 4  ;;  %v2705_v10 = vrot.slane %v4733_v7, 5 }
  0xc1   : > { %v2696_v54 = vsel %vm4352_vm9, %v3418_v8, %v2695_v47  ;;  %v2699_v62 = vsel %vm4352_vm9, %v2697_v19, %v2698_v58  ;;  %v2709_v26 = vrot.slane %v4741_v3, 5  ;;  %v3420_v12 = vrot.slane %v2633_v1, 9 }
  0xc2   : > { %v2703_v61 = vsel %vm4352_vm9, %v3419_v45, %v2702_v11  ;;  %v2706_v48 = vsel %vm4352_vm9, %v2704_v33, %v2705_v10  ;;  %v3427_v7 = vcombine.low %v2696_v54, %v2699_v62  ;;  %v2712_v55 = vrot.slane %v4748_v6, 5  ;;  %v3864_v6 = vld [vmem:[%s5160_s4 + $0x30] sm:$0xff]  }
  0xc3   : > { %v3428_v46 = vcombine.low %v2703_v61, %v2706_v48  ;;  %v2711_v63 = vrot.slane %v2709_v26, 4  ;;  %v2710_v3 = vsel %vm4352_vm9, %v3420_v12, %v2709_v26  ;;  %3723 = vmatprep.subr.bf16.mxu1 %v3864_v6 }
  0xc4   : > { %3724 = vmatpush3.bf16.msra.mxu1 %v3864_v6 }
  0xc5   : > { %3706 = vmatmul.mubr.msk.bf16.vlgmr.msra.gmra.mxu0 %vm671_vm3, %v3423_v38  ;;  %v2713_v2 = vsel %vm4352_vm9, %v2711_v63, %v2712_v55  ;;  %3725 = vmatprep.subr.bf16.mxu1 %v3865_v35 }
  0xc6   : > { %3709 = vmatprep.mubr.msk.bf16.mxu0 %vm671_vm3, %v3424_v41  ;;  %v3429_v15 = vcombine.low %v2710_v3, %v2713_v2 }
  0xc8   : > { %3726 = vmatpush3.bf16.msra.mxu1 %v3865_v35 }
  0xc9   : > { %3727 = vmatprep.subr.bf16.mxu1 %v3866_v18 }
  0xcc   : > { %3728 = vmatpush3.bf16.msra.mxu1 %v3866_v18 }
  0xcd   : > { %3710 = vmatmul.mubr.msk.bf16.gmra.mxu0 %vm671_vm3, %v3425_v17  ;;  %3729 = vmatprep.subr.bf16.mxu1 %v3867_v44 }
  0xce   : > { %3713 = vmatprep.mubr.msk.bf16.mxu0 %vm671_vm3, %v3426_v5 }
  0xd0   : > { %3730 = vmatpush3.bf16.msra.mxu1 %v3867_v44 }
  0xd1   : > { %3731 = vmatprep.subr.bf16.mxu1 %v3868_v49 }
  0xd4   : > { %3732 = vmatpush3.bf16.msra.mxu1 %v3868_v49 }
  0xd5   : > { %3714 = vmatmul.mubr.msk.bf16.gmra.mxu0 %vm671_vm3, %v3427_v7  ;;  %3733 = vmatprep.subr.bf16.mxu1 %v3869_v34 }
  0xd6   : > { %3717 = vmatprep.mubr.msk.bf16.mxu0 %vm671_vm3, %v3428_v46 }
  0xd8   : > { %3734 = vmatpush3.bf16.msra.mxu1 %v3869_v34 }
  0xd9   : > { %3735 = vmatprep.subr.bf16.mxu1 %v3870_v50 }
  0xdc   : > { %3736 = vmatpush3.bf16.msra.mxu1 %v3870_v50 }
  0xdd   : > { %3718 = vmatmul.mubr.msk.bf16.gmra.mxu0 %vm671_vm3, %v3429_v15 }
  0xfb   : > { %v3581_v52 = vpop.f32.mrf.mxu1 }
  0xfd   : > { %v898_v42 = vpop.f32.mrf.mxu1 }
  0xff   : > { %v3582_v51 = vpop.f32.mrf.mxu1 }
 0x101   : > { %v3563_v21 = vpop.f32.mrf.mxu0  ;;  %v901_v22 = vpop.f32.mrf.mxu1 }
 0x102   : > { %v907_v28 = vadd.f32 %v3581_v52, %v3563_v21 }
 0x103   : > { %v734_v36 = vpop.f32.mrf.mxu0  ;;  %v3585_v40 = vpop.f32.mrf.mxu1 }
 0x104   : > { %v899_v20 = vadd.f32 %v898_v42, %v734_v36 }
 0x105   : > { %v3564_v27 = vpop.f32.mrf.mxu0  ;;  %v914_v29 = vpop.f32.mrf.mxu1 }
 0x106   : > { %v910_v14 = vadd.f32 %v3582_v51, %v3564_v27 }
 0x107   : > { %v737_v30 = vpop.f32.mrf.mxu0  ;;  %v3586_v4 = vpop.f32.mrf.mxu1 }
 0x108   : > { %v902_v31 = vadd.f32 %v901_v22, %v737_v30 }
 0x109   : > { %v917_v9 = vpop.f32.mrf.mxu1 }
 0x10b   : > { %v3567_v43 = vpop.f32.mrf.mxu0 }
 0x10c   : > { %v923_v25 = vadd.f32 %v3585_v40, %v3567_v43 }
 0x10d   : > { %v750_v37 = vpop.f32.mrf.mxu0  ;;  %v3589_v38 = vpop.f32.mrf.mxu1 }
 0x10e   : > { %v915_v41 = vadd.f32 %v914_v29, %v750_v37 }
 0x10f   : > { %v3568_v13 = vpop.f32.mrf.mxu0  ;;  %v930_v16 = vpop.f32.mrf.mxu1 }
 0x110   : > { %v926_v32 = vadd.f32 %v3586_v4, %v3568_v13 }
 0x111   : > { %v753_v59 = vpop.f32.mrf.mxu0  ;;  %v3590_v24 = vpop.f32.mrf.mxu1 }
 0x112   : > { %v918_v0 = vadd.f32 %v917_v9, %v753_v59 }
 0x113   : > { %v3571_v56 = vpop.f32.mrf.mxu0  ;;  %v933_v47 = vpop.f32.mrf.mxu1 }
 0x114   : > { %v939_v57 = vadd.f32 %v3589_v38, %v3571_v56 }
 0x115   : > { %v766_v23 = vpop.f32.mrf.mxu0  ;;  %v3593_v53 = vpop.f32.mrf.mxu1 }
 0x116   : > { %v931_v11 = vadd.f32 %v930_v16, %v766_v23 }
 0x117   : > { %v3572_v39 = vpop.f32.mrf.mxu0  ;;  %v946_v17 = vpop.f32.mrf.mxu1 }
 0x118   : > { %v942_v5 = vadd.f32 %v3590_v24, %v3572_v39 }
 0x119   : > { %v769_v8 = vpop.f32.mrf.mxu0  ;;  %v3594_v19 = vpop.f32.mrf.mxu1 }
 0x11a   : > { %v934_v58 = vadd.f32 %v933_v47, %v769_v8 }
 0x11b   : > { %v949_v45 = vpop.f32.mrf.mxu1 }
 0x11d   : > { %v3575_v33 = vpop.f32.mrf.mxu0  ;;  %v4849_v10 = vpop.f32.mrf.mxu1 }
 0x11e   : > { %v955_v54 = vadd.f32 %v3593_v53, %v3575_v33 }
 0x11f   : > { %v782_v62 = vpop.f32.mrf.mxu0  ;;  %v4851_v26 = vpop.f32.mrf.mxu1 }
 0x120   : > { %v947_v61 = vadd.f32 %v946_v17, %v782_v62 }
 0x121   : > { %v3576_v48 = vpop.f32.mrf.mxu0  ;;  %v4853_v1 = vpop.f32.mrf.mxu1 }
 0x122   : > { %v958_v7 = vadd.f32 %v3594_v19, %v3576_v48 }
 0x123   : > { %v785_v46 = vpop.f32.mrf.mxu0  ;;  %v4855_v12 = vpop.f32.mrf.mxu1 }
 0x124   : > { %v950_v63 = vadd.f32 %v949_v45, %v785_v46 }
 0x125   : > { %v3599_v55 = vpop.f32.mrf.mxu0  ;;  %v4857_v3 = vpop.f32.mrf.mxu1 }
 0x126   : > { %v4859_v2 = vadd.f32 %v3599_v55, %v907_v28 }
 0x127   : > { %v1131_v15 = vpop.f32.mrf.mxu0  ;;  %v4861_v60 = vpop.f32.mrf.mxu1 }
 0x128   : > { %v4863_v6 = vadd.f32 %v1131_v15, %v899_v20 }
 0x129   : > { %v3600_v52 = vpop.f32.mrf.mxu0  ;;  %v4865_v35 = vpop.f32.mrf.mxu1 }
 0x12a   : > { %v4867_v42 = vadd.f32 %v3600_v52, %v910_v14 }
 0x12b   : > { %v1134_v51 = vpop.f32.mrf.mxu0  ;;  %v4869_v18 = vpop.f32.mrf.mxu1 }
 0x12c   : > { %v4871_v21 = vadd.f32 %v1134_v51, %v902_v31 }
 0x12d   : > { %v3603_v22 = vpop.f32.mrf.mxu0  ;;  %v4873_v36 = vpop.f32.mrf.mxu1 }
 0x12e   : > { %v4875_v28 = vadd.f32 %v3603_v22, %v923_v25 }
 0x12f   : > { %v1147_v40 = vpop.f32.mrf.mxu0  ;;  %v4877_v44 = vpop.f32.mrf.mxu1 }
 0x130   : > { %v4879_v20 = vadd.f32 %v1147_v40, %v915_v41 }
 0x131   : > { %v3604_v27 = vpop.f32.mrf.mxu0  ;;  %v4881_v29 = vpop.f32.mrf.mxu1 }
 0x132   : > { %v4883_v14 = vadd.f32 %v3604_v27, %v926_v32 }
 0x133   : > { %v1150_v30 = vpop.f32.mrf.mxu0  ;;  %v4885_v4 = vpop.f32.mrf.mxu1 }
 0x134   : > { %v4887_v49 = vadd.f32 %v1150_v30, %v918_v0 }
 0x135   : > { %v3607_v31 = vpop.f32.mrf.mxu0  ;;  %v4889_v9 = vpop.f32.mrf.mxu1 }
 0x136   : > { %v4891_v43 = vadd.f32 %v3607_v31, %v939_v57 }
 0x137   : > { %v1163_v34 = vpop.f32.mrf.mxu0  ;;  %v4893_v25 = vpop.f32.mrf.mxu1 }
 0x138   : > { %v4895_v37 = vadd.f32 %v1163_v34, %v931_v11 }
 0x139   : > { %v3608_v38 = vpop.f32.mrf.mxu0  ;;  %v4897_v41 = vpop.f32.mrf.mxu1 }
 0x13a   : > { %5170 = vst [vmem:[#allocation6_spill] sm:$0xff] %v4897_v41  ;;  %v4899_v13 = vadd.f32 %v3608_v38, %v942_v5 }
 0x13b   : > { %v1166_v16 = vpop.f32.mrf.mxu0  ;;  %v4901_v50 = vpop.f32.mrf.mxu1 }
 0x13c   : > { %5171 = vst [vmem:[#allocation7_spill] sm:$0xff] %v4901_v50  ;;  %v4903_v32 = vadd.f32 %v1166_v16, %v934_v58 }
 0x13d   : > { %v3611_v59 = vpop.f32.mrf.mxu0  ;;  %v4905_v24 = vpop.f32.mrf.mxu1 }
 0x13e   : > { %v4907_v0 = vadd.f32 %v3611_v59, %v955_v54 }
 0x13f   : > { %v1179_v56 = vpop.f32.mrf.mxu0  ;;  %v4909_v47 = vpop.f32.mrf.mxu1 }
 0x140   : > { %v4911_v57 = vadd.f32 %v1179_v56, %v947_v61 }
 0x141   : > { %v3612_v23 = vpop.f32.mrf.mxu0  ;;  %v4913_v53 = vpop.f32.mrf.mxu1 }
 0x142   : > { %v4915_v11 = vadd.f32 %v3612_v23, %v958_v7 }
 0x143   : > { %v1182_v39 = vpop.f32.mrf.mxu0  ;;  %v4917_v17 = vpop.f32.mrf.mxu1 }
 0x144   : > { %5172 = vst [vmem:[#allocation8_spill] sm:$0xff] %v4915_v11  ;;  %v4919_v5 = vadd.f32 %v1182_v39, %v950_v63 }
 0x145   : > { %v3635_v8 = vpop.f32.mrf.mxu0  ;;  %v4921_v19 = vpop.f32.mrf.mxu1 }
 0x146   : > { %5173 = vst [vmem:[#allocation9_spill] sm:$0xff] %v4919_v5 }
 0x147   : > { %v1712_v58 = vpop.f32.mrf.mxu0  ;;  %v4923_v45 = vpop.f32.mrf.mxu1 }
 0x149   : > { %v3636_v33 = vpop.f32.mrf.mxu0  ;;  %v4925_v54 = vpop.f32.mrf.mxu1 }
 0x14b   : > { %v1715_v62 = vpop.f32.mrf.mxu0  ;;  %v4927_v61 = vpop.f32.mrf.mxu1 }
 0x14c   : > { %5174 = vst [vmem:[#allocation10_spill] sm:$0xff] %v4927_v61 }
 0x14d   : > { %v3639_v48 = vpop.f32.mrf.mxu0  ;;  %v4929_v7 = vpop.f32.mrf.mxu1 }
 0x14e   : > { %5175 = vst [vmem:[#allocation11_spill] sm:$0xff] %v4929_v7 }
 0x14f   : > { %v1728_v46 = vpop.f32.mrf.mxu0  ;;  %v4931_v55 = vpop.f32.mrf.mxu1 }
 0x150   : > { %5176 = vst [vmem:[#allocation12_spill] sm:$0xff] %v4931_v55 }
 0x151   : > { %v4933_v63 = vpop.f32.mrf.mxu0  ;;  %v4935_v15 = vpop.f32.mrf.mxu1 }
 0x152   : > { %5177 = vst [vmem:[#allocation13_spill] sm:$0xff] %v4935_v15 }
 0x153   : > { %v4937_v52 = vpop.f32.mrf.mxu0  ;;  %v4939_v51 = vpop.f32.mrf.mxu1 }
 0x154   : > { %5178 = vst [vmem:[#allocation14_spill] sm:$0xff] %v4939_v51 }
 0x155   : > { %v4941_v22 = vpop.f32.mrf.mxu0 }
 0x157   : > { %v4943_v40 = vpop.f32.mrf.mxu0  ;;  %v4945_v27 = vpop.f32.mrf.mxu1 }
 0x158   : > { %5179 = vst [vmem:[#allocation15_spill] sm:$0xff] %v4943_v40  ;;  %5180 = vst [vmem:[#allocation16_spill] sm:$0xff] %v4945_v27  ;;  %v1393_v40 = vadd.f32 %v4851_v26, %v4863_v6  ;;  %v1399_v6 = vadd.f32 %v4857_v3, %v4875_v28 }
 0x159   : > { %v4947_v30 = vpop.f32.mrf.mxu0  ;;  %v4949_v31 = vpop.f32.mrf.mxu1 }
 0x15a   : > { %5181 = vst [vmem:[#allocation17_spill] sm:$0xff] %v4947_v30  ;;  %5182 = vst [vmem:[#allocation18_spill] sm:$0xff] %v4949_v31  ;;  %v1395_v30 = vadd.f32 %v4849_v10, %v4859_v2 }
 0x15b   : > { %v4951_v34 = vpop.f32.mrf.mxu0  ;;  %v4953_v38 = vpop.f32.mrf.mxu1 }
 0x15c   : > { %5183 = vst [vmem:[#allocation19_spill] sm:$0xff] %v4951_v34  ;;  %5184 = vst [vmem:[#allocation20_spill] sm:$0xff] %v4953_v38  ;;  %v1777_v61 = vadd.f32 %v3635_v8, %v1395_v30 }
 0x15d   : > { %v4955_v16 = vpop.f32.mrf.mxu0  ;;  %v4959_v56 = vpop.f32.mrf.mxu1 }
 0x15e   : > { %5185 = vst [vmem:[#allocation21_spill] sm:$0xff] %v4955_v16  ;;  %5187 = vst [vmem:[#allocation23_spill] sm:$0xff] %v4959_v56  ;;  %v2031_v10 = vadd.f32 %v4905_v24, %v1777_v61 }
 0x15f   : > { %v4957_v59 = vpop.f32.mrf.mxu0 }
 0x160   : > { %5186 = vst [vmem:[#allocation22_spill] sm:$0xff] %v4957_v59 }
 0x161   : > { %v4961_v23 = vpop.f32.mrf.mxu0 }
 0x162   : > { %5188 = vst [vmem:[#allocation24_spill] sm:$0xff] %v4961_v23  ;;  %v3689_v51 = vpop.f32.mrf.mxu1 }
 0x163   : > { %v4963_v39 = vpop.f32.mrf.mxu0 }
 0x164   : > { %5189 = vst [vmem:[#allocation25_spill] sm:$0xff] %v4963_v39  ;;  %v2547_v5 = vpop.f32.mrf.mxu1 }
 0x165   : > { %v3671_v27 = vpop.f32.mrf.mxu0 }
 0x166   : > { %v3690_v41 = vpop.f32.mrf.mxu1 }
 0x167   : > { %v2165_v50 = vpop.f32.mrf.mxu0 }
 0x168   : > { %v2550_v34 = vpop.f32.mrf.mxu1 }
 0x169   : > { %v3672_v15 = vpop.f32.mrf.mxu0 }
 0x16b   : > { %v2168_v31 = vpop.f32.mrf.mxu0 }
 0x16c   : > { %v4967_v16 = vpop.f32.mrf.mxu1 }
 0x16d   : > { %v3675_v11 = vpop.f32.mrf.mxu0  ;;  %5191 = vst [vmem:[#allocation27_spill] sm:$0xff] %v4967_v16 }
 0x16e   : > { %v4973_v23 = vpop.f32.mrf.mxu1 }
 0x16f   : > { %v2181_v38 = vpop.f32.mrf.mxu0  ;;  %5194 = vst [vmem:[#allocation30_spill] sm:$0xff] %v4973_v23 }
 0x171   : > { %v4965_v55 = vpop.f32.mrf.mxu0 }
 0x172   : > { %5190 = vst [vmem:[#allocation26_spill] sm:$0xff] %v4965_v55  ;;  %v4983_v55 = vpop.f32.mrf.mxu1 }
 0x173   : > { %v4969_v59 = vpop.f32.mrf.mxu0 }
 0x174   : > { %5192 = vst [vmem:[#allocation28_spill] sm:$0xff] %v4969_v59  ;;  %v1775_v59 = vadd.f32 %v1712_v58, %v1393_v40 }
 0x175   : > { %v4971_v56 = vpop.f32.mrf.mxu0 }
 0x176   : > { %5193 = vst [vmem:[#allocation29_spill] sm:$0xff] %v4971_v56  ;;  %v1396_v56 = vadd.f32 %v4853_v1, %v4867_v42  ;;  %v2029_v8 = vadd.f32 %v4909_v47, %v1775_v59  ;;  %v2230_v1 = vadd.f32 %v3671_v27, %v2031_v10  ;;  %v1397_v42 = vadd.f32 %v4861_v60, %v4879_v20 }
 0x177   : > { %v4975_v39 = vpop.f32.mrf.mxu0  ;;  %v1398_v60 = vadd.f32 %v4869_v18, %v4887_v49  ;;  %v5028_v18 = vld [vmem:[%s5159_s3] ss:$0 sm:$0xff] }
 0x178   : > { %5195 = vst [vmem:[#allocation31_spill] sm:$0xff] %v4975_v39  ;;  %v1394_v39 = vadd.f32 %v4855_v12, %v4871_v21  ;;  %v1778_v2 = vadd.f32 %v3636_v33, %v1396_v56  ;;  %v1781_v21 = vadd.f32 %v3639_v48, %v1399_v6  ;;  %v2228_v24 = vadd.f32 %v2165_v50, %v2029_v8 }
 0x179   : > { %v4979_v7 = vpop.f32.mrf.mxu0  ;;  %v1400_v33 = vadd.f32 %v4865_v35, %v4883_v14  ;;  %v1779_v61 = vadd.f32 %v1728_v46, %v1397_v42  ;;  %v2612_v47 = vadd.f32 %v3689_v51, %v2230_v1  ;;  %v1403_v14 = vadd.f32 %v4873_v36, %v4891_v43 }
 0x17a   : > { %5196 = vst [vmem:[#allocation32_spill] sm:$0xff] %v4979_v7  ;;  %v4994_v7 = vpop.f32.mrf.mxu1  ;;  %v1776_v30 = vadd.f32 %v1715_v62, %v1394_v39  ;;  %v2032_v12 = vadd.f32 %v4913_v53, %v1778_v2  ;;  %v2035_v50 = vadd.f32 %v4921_v19, %v1781_v21  ;;  %v2610_v48 = vadd.f32 %v2547_v5, %v2228_v24 }
 0x17b   : > { %v4985_v16 = vpop.f32.mrf.mxu0  ;;  %v1782_v20 = vadd.f32 %v4933_v63, %v1400_v33  ;;  %v1401_v46 = vadd.f32 %v4877_v44, %v4895_v37  ;;  %v1404_v5 = vadd.f32 %v4881_v29, %v4899_v13  ;;  %v1402_v44 = vadd.f32 %v4885_v4, %v4903_v32  ;;  %v5199_v32 = vld [vmem:[#allocation26_spill] sm:$0xff]  ;;  %v5204_v42 = vld [vmem:[#allocation28_spill] sm:$0xff] }
 0x17c   : > { %v5008_v40 = vpop.f32.mrf.mxu1  ;;  %v2030_v28 = vadd.f32 %v4917_v17, %v1776_v30  ;;  %v2231_v62 = vadd.f32 %v3672_v15, %v2032_v12  ;;  %v2033_v17 = vadd.f32 %v4923_v45, %v1779_v61  ;;  %v1780_v15 = vadd.f32 %v4937_v52, %v1398_v60  ;;  %v5202_v30 = vld [vmem:[#allocation17_spill] sm:$0xff]  ;;  %v5206_v60 = vld [vmem:[#allocation19_spill] sm:$0xff] }
 0x17d   : > { %v4989_v23 = vpop.f32.mrf.mxu0  ;;  %v2234_v36 = vadd.f32 %v3675_v11, %v2035_v50  ;;  %v2036_v37 = vadd.f32 %v4925_v54, %v1782_v20  ;;  %v1785_v45 = vadd.f32 %v4941_v22, %v1403_v14  ;;  %v1405_v29 = vadd.f32 %v4893_v25, %v4911_v57  ;;  %v5198_v11 = vld [vmem:[#allocation15_spill] sm:$0xff]  ;;  %v5203_v25 = vld [vmem:[#allocation30_spill] sm:$0xff]  ;;  %v5207_v50 = vld [vmem:[#allocation29_spill] sm:$0xff] }
 0x17e   : > { %v2229_v27 = vadd.f32 %v2168_v31, %v2030_v28  ;;  %v5023_v51 = vpop.f32.mrf.mxu1  ;;  %v2613_v19 = vadd.f32 %v3690_v41, %v2231_v62  ;;  %v2232_v63 = vadd.f32 %v2181_v38, %v2033_v17  ;;  %v1407_v31 = vadd.f32 %v4889_v9, %v4907_v0  ;;  %v5197_v41 = vld [vmem:[#allocation10_spill] sm:$0xff]  ;;  %v5200_v38 = vld [vmem:[#allocation27_spill] sm:$0xff] }
 0x17f   : > { %v4996_v26 = vpop.f32.mrf.mxu0  ;;  %v2034_v13 = vadd.f32 %v5197_v41, %v1780_v15  ;;  %v1783_v4 = vadd.f32 %v5198_v11, %v1401_v46  ;;  %v2235_v54 = vadd.f32 %v5199_v32, %v2036_v37  ;;  %v2616_v2 = vadd.f32 %v5200_v38, %v2234_v36  ;;  %v5210_v36 = vld [vmem:[#allocation13_spill] sm:$0xff] }
 0x180   : > { %v2611_v59 = vadd.f32 %v2550_v34, %v2229_v27  ;;  %v3698_v10 = vpop.f32.mrf.mxu1  ;;  %v5201_v34 = vld [vmem:[#allocation11_spill] sm:$0xff]  ;;  %v1786_v1 = vadd.f32 %v5202_v30, %v1404_v5  ;;  %v2614_v57 = vadd.f32 %v5203_v25, %v2232_v63  ;;  %v1784_v20 = vadd.f32 %v5206_v60, %v1402_v44  ;;  %v5209_v5 = vld [vmem:[#allocation6_spill] sm:$0xff]  ;;  %v5211_v37 = vld [vmem:[#allocation21_spill] sm:$0xff] }
 0x181   : > { %v5003_v58 = vpop.f32.mrf.mxu0  ;;  %v2039_v8 = vadd.f32 %v5201_v34, %v1785_v45  ;;  %v2233_v12 = vadd.f32 %v5204_v42, %v2034_v13  ;;  %v1789_v45 = vadd.f32 %v5211_v37, %v1407_v31  ;;  %v5212_v63 = vld [vmem:[#allocation31_spill] sm:$0xff]  ;;  %v5213_v41 = vld [vmem:[#allocation9_spill] sm:$0xff]  ;;  %v5217_v38 = vld [vmem:[#allocation32_spill] sm:$0xff] }
 0x182   : > { %v2582_v27 = vpop.f32.mrf.mxu1  ;;  %v5214_v13 = vld [vmem:[#allocation7_spill] sm:$0xff] }
 0x183   : > { %v5010_v3 = vpop.f32.mrf.mxu0  ;;  %v1406_v11 = vadd.f32 %v5214_v13, %v5213_v41 }
 0x185   : > { %v3707_v53 = vpop.f32.mrf.mxu0 }
 0x186   : > { %v2866_v35 = vadd.f32 %v3707_v53, %v2612_v47  ;;  %v5205_v47 = vld [vmem:[#allocation12_spill] sm:$0xff]  ;;  %v2617_v53 = vadd.f32 %v4983_v55, %v2235_v54  ;;  %v2615_v55 = vadd.f32 %v4994_v7, %v2233_v12  ;;  %v5216_v54 = vld [vmem:[#allocation22_spill] sm:$0xff] }
 0x187   : > { %v2801_v49 = vpop.f32.mrf.mxu0  ;;  %v2037_v62 = vadd.f32 %v5205_v47, %v1783_v4  ;;  %v5215_v4 = vld [vmem:[#allocation14_spill] sm:$0xff] }
 0x188   : > { %v2864_v43 = vadd.f32 %v2801_v49, %v2610_v48  ;;  %v2889_v56 = vadd.f32 %v5028_v18, %v2866_v35  ;;  %v2238_v48 = vadd.f32 %v5207_v50, %v2039_v8  ;;  %v5208_v49 = vld [vmem:[#allocation8_spill] sm:$0xff]  ;;  %v2038_v32 = vadd.f32 %v5215_v4, %v1784_v20 }
 0x189   : > { %v3708_v52 = vpop.f32.mrf.mxu0  ;;  %v5218_v8 = vld [vmem:[#allocation16_spill] sm:$0xff] }
 0x18a   : > { %v2867_v39 = vadd.f32 %v3708_v52, %v2613_v19  ;;  %v2887_v6 = vadd.f32 %v5028_v18, %v2864_v43  ;;  %v2905_v24 = vmax.f32 %v2889_v56, 0.0  ;;  %v1408_v19 = vadd.f32 %v5209_v5, %v5208_v49 }
 0x18b   : > { %v2804_v22 = vpop.f32.mrf.mxu0  ;;  %v2040_v43 = vadd.f32 %v5210_v36, %v1786_v1  ;;  %v2236_v52 = vadd.f32 %v5212_v63, %v2037_v62  ;;  %v2043_v30 = vadd.f32 %v5218_v8, %v1789_v45  ;;  %v5219_v1 = vld [vmem:[#allocation24_spill] sm:$0xff]  ;;  %v5223_v36 = vld [vmem:[#allocation23_spill] sm:$0xff] }
 0x18c   : > { %v2890_v9 = vadd.f32 %v5028_v18, %v2867_v39  ;;  %v2865_v0 = vadd.f32 %v2804_v22, %v2611_v59  ;;  %v2903_v14 = vmax.f32 %v2887_v6, 0.0  ;;  %v1787_v22 = vadd.f32 %v5216_v54, %v1405_v29  ;;  %v3701_v6 = vpop.f32.mrf.mxu1 }
 0x18d   : > { %v3711_v21 = vpop.f32.mrf.mxu0  ;;  %v1790_v25 = vadd.f32 %v5219_v1, %v1408_v19  ;;  %v2237_v29 = vadd.f32 %v4985_v16, %v2038_v32  ;;  %v2242_v60 = vadd.f32 %v4989_v23, %v2043_v30 }
 0x18e   : > { %v2906_v33 = vmax.f32 %v2890_v9, 0.0  ;;  %v2888_v61 = vadd.f32 %v5028_v18, %v2865_v0  ;;  %v2870_v28 = vadd.f32 %v3711_v21, %v2616_v2  ;;  %v2239_v2 = vadd.f32 %v5217_v38, %v2040_v43  ;;  %v2595_v20 = vpop.f32.mrf.mxu1 }
 0x18f   : > { %v2817_v35 = vpop.f32.mrf.mxu0  ;;  %v2620_v9 = vadd.f32 %v5008_v40, %v2238_v48  ;;  %v2624_v45 = vadd.f32 %v3701_v6, %v2242_v60 }
 0x190   : > { %v2920_v46 = vpack.c.bf16 %v2906_v33, %v2905_v24  ;;  %v2904_v17 = vmax.f32 %v2888_v61, 0.0  ;;  %v2868_v15 = vadd.f32 %v2817_v35, %v2614_v57  ;;  %v2893_v59 = vadd.f32 %v5028_v18, %v2870_v28  ;;  %v5220_v33 = vld [vmem:[#allocation18_spill] sm:$0xff]  ;;  %v5221_v28 = vld [vmem:[#allocation25_spill] sm:$0xff]  ;;  %v5222_v35 = vld [vmem:[#allocation20_spill] sm:$0xff]  ;;  %v3702_v43 = vpop.f32.mrf.mxu1 }
 0x191   : > { %v3712_v44 = vpop.f32.mrf.mxu0  ;;  %v2618_v57 = vadd.f32 %v5023_v51, %v2236_v52  ;;  %v2041_v61 = vadd.f32 %v5220_v33, %v1787_v22  ;;  %v1788_v47 = vadd.f32 %v5221_v28, %v1406_v11  ;;  %v2621_v62 = vadd.f32 %v3698_v10, %v2239_v2 }
 0x192   : > { %v2871_v56 = vadd.f32 %v3712_v44, %v2617_v53  ;;  %v2919_v39 = vpack.c.bf16 %v2904_v17, %v2903_v14  ;;  %v2891_v0 = vadd.f32 %v5028_v18, %v2868_v15  ;;  %v2909_v12 = vmax.f32 %v2893_v59, 0.0  ;;  %v2598_v13 = vpop.f32.mrf.mxu1 }
 0x193   : > { %v2820_v31 = vpop.f32.mrf.mxu0  ;;  %v2044_v14 = vadd.f32 %v5222_v35, %v1790_v25  ;;  %v2619_v15 = vadd.f32 %v2582_v27, %v2237_v29  ;;  %v2042_v10 = vadd.f32 %v5223_v36, %v1788_v47 }
 0x194   : > { %v2894_v7 = vadd.f32 %v5028_v18, %v2871_v56  ;;  %v2869_v34 = vadd.f32 %v2820_v31, %v2615_v55  ;;  %3737 = vmatprep.mubr.bf16.mxu1 %v2919_v39  ;;  %v2907_v50 = vmax.f32 %v2891_v0, 0.0 }
 0x195   : > { %v3715_v42 = vpop.f32.mrf.mxu0  ;;  %3738 = vmatmul.mubr.bf16.vlgmr.msra.gmra.mxu1 %v2920_v46  ;;  %v2240_v46 = vadd.f32 %v4996_v26, %v2041_v61  ;;  %v2243_v23 = vadd.f32 %v5003_v58, %v2044_v14  ;;  %v2241_v27 = vadd.f32 %v5010_v3, %v2042_v10 }
 0x196   : > { %v2910_v21 = vmax.f32 %v2894_v7, 0.0  ;;  %v2892_v40 = vadd.f32 %v5028_v18, %v2869_v34  ;;  %v2874_v24 = vadd.f32 %v3715_v42, %v2620_v9 }
 0x197   : > { %v2833_v53 = vpop.f32.mrf.mxu0  ;;  %v2622_v26 = vadd.f32 %v2595_v20, %v2240_v46  ;;  %v2625_v58 = vadd.f32 %v3702_v43, %v2243_v23  ;;  %v2623_v2 = vadd.f32 %v2598_v13, %v2241_v27 }
 0x198   : > { %v2908_v51 = vmax.f32 %v2892_v40, 0.0  ;;  %v2872_v48 = vadd.f32 %v2833_v53, %v2618_v57  ;;  %v2922_v16 = vpack.c.bf16 %v2910_v21, %v2909_v12  ;;  %v2897_v49 = vadd.f32 %v5028_v18, %v2874_v24  ;;  %v3439_v21 = vld [vmem:[%s5161_s5] ss:$0 sm:$0xff] }
 0x199   : > { %v3716_v17 = vpop.f32.mrf.mxu0 }
 0x19a   : > { %v2875_v5 = vadd.f32 %v3716_v17, %v2621_v62  ;;  %v2921_v19 = vpack.c.bf16 %v2908_v51, %v2907_v50  ;;  %v2895_v63 = vadd.f32 %v5028_v18, %v2872_v48  ;;  %v2913_v59 = vmax.f32 %v2897_v49, 0.0 }
 0x19b   : > { %v2836_v37 = vpop.f32.mrf.mxu0 }
 0x19c   : > { %v2898_v52 = vadd.f32 %v5028_v18, %v2875_v5  ;;  %v2873_v44 = vadd.f32 %v2836_v37, %v2619_v15  ;;  %3741 = vmatprep.mubr.bf16.mxu1 %v2921_v19  ;;  %v2911_v4 = vmax.f32 %v2895_v63, 0.0 }
 0x19d   : > { %v3719_v55 = vpop.f32.mrf.mxu0  ;;  %3742 = vmatmul.mubr.bf16.gmra.mxu1 %v2922_v16 }
 0x19e   : > { %v2914_v56 = vmax.f32 %v2898_v52, 0.0  ;;  %v2896_v39 = vadd.f32 %v5028_v18, %v2873_v44  ;;  %v2878_v41 = vadd.f32 %v3719_v55, %v2624_v45 }
 0x19f   : > { %v2849_v11 = vpop.f32.mrf.mxu0 }
 0x1a0   : > { %v2912_v32 = vmax.f32 %v2896_v39, 0.0  ;;  %v2876_v54 = vadd.f32 %v2849_v11, %v2622_v26  ;;  %v2924_v22 = vpack.c.bf16 %v2914_v56, %v2913_v59  ;;  %v2901_v6 = vadd.f32 %v5028_v18, %v2878_v41 }
 0x1a1   : > { %v3720_v38 = vpop.f32.mrf.mxu0 }
 0x1a2   : > { %v2879_v31 = vadd.f32 %v3720_v38, %v2625_v58  ;;  %v2923_v3 = vpack.c.bf16 %v2912_v32, %v2911_v4  ;;  %v2899_v0 = vadd.f32 %v5028_v18, %v2876_v54  ;;  %v2917_v8 = vmax.f32 %v2901_v6, 0.0 }
 0x1a3   : > { %v2852_v9 = vpop.f32.mrf.mxu0 }
 0x1a4   : > { %v2902_v7 = vadd.f32 %v5028_v18, %v2879_v31  ;;  %v2877_v34 = vadd.f32 %v2852_v9, %v2623_v2  ;;  %3745 = vmatprep.mubr.bf16.mxu1 %v2923_v3  ;;  %v2915_v25 = vmax.f32 %v2899_v0, 0.0 }
 0x1a5   : > { %3746 = vmatmul.mubr.bf16.gmra.mxu1 %v2924_v22 }
 0x1a6   : > { %v2918_v30 = vmax.f32 %v2902_v7, 0.0  ;;  %v2900_v1 = vadd.f32 %v5028_v18, %v2877_v34 }
 0x1a8   : > { %v2916_v57 = vmax.f32 %v2900_v1, 0.0  ;;  %v2926_v29 = vpack.c.bf16 %v2918_v30, %v2917_v8 }
 0x1aa   : > { %v2925_v42 = vpack.c.bf16 %v2916_v57, %v2915_v25 }
 0x1ac   : > { %3749 = vmatprep.mubr.bf16.mxu1 %v2925_v42 }
 0x1ad   : > { %3750 = vmatmul.mubr.bf16.gmra.mxu1 %v2926_v29 }
 0x255   : > { %v3739_v12 = vpop.f32.mrf.mxu1 }
 0x256   : > { %v3041_v18 = vadd.f32 %v3739_v12, %v3439_v21 }
 0x257   : > { %v3032_v40 = vpop.f32.mrf.mxu1 }
 0x258   : > { %v3033_v24 = vadd.f32 %v3439_v21, %v3032_v40 }
 0x259   : > { %v3740_v33 = vpop.f32.mrf.mxu1 }
 0x25a   : > { %3095 = vxpose.xlu0.b32.start [1/16] (narrow) %v3033_v24, 16  ;;  %v3044_v60 = vadd.f32 %v3740_v33, %v3439_v21 }
 0x25b   : > { %v3035_v61 = vpop.f32.mrf.mxu1 }
 0x25c   : > { %v3036_v28 = vadd.f32 %v3439_v21, %v3035_v61 }
 0x25d   : > { %v3743_v47 = vpop.f32.mrf.mxu1 }
 0x25e   : > { %3096 = vxpose.xlu0.b32.cont [2/16] (narrow) %v3036_v28, 16  ;;  %v3057_v16 = vadd.f32 %v3743_v47, %v3439_v21 }
 0x25f   : > { %v3048_v62 = vpop.f32.mrf.mxu1 }
 0x260   : > { %v3049_v53 = vadd.f32 %v3439_v21, %v3048_v62 }
 0x261   : > { %v3744_v20 = vpop.f32.mrf.mxu1 }
 0x262   : > { %3097 = vxpose.xlu0.b32.cont [3/16] (narrow) %v3041_v18, 16  ;;  %v3060_v14 = vadd.f32 %v3744_v20, %v3439_v21 }
 0x263   : > { %v3051_v50 = vpop.f32.mrf.mxu1 }
 0x264   : > { %v3052_v51 = vadd.f32 %v3439_v21, %v3051_v50 }
 0x265   : > { %v3747_v48 = vpop.f32.mrf.mxu1 }
 0x266   : > { %3098 = vxpose.xlu0.b32.cont [4/16] (narrow) %v3044_v60, 16  ;;  %v3073_v19 = vadd.f32 %v3747_v48, %v3439_v21 }
 0x267   : > { %v3064_v35 = vpop.f32.mrf.mxu1 }
 0x268   : > { %v3065_v17 = vadd.f32 %v3439_v21, %v3064_v35 }
 0x269   : > { %v3748_v46 = vpop.f32.mrf.mxu1 }
 0x26a   : > { %3099 = vxpose.xlu0.b32.cont [5/16] (narrow) %v3049_v53, 16  ;;  %v3076_v10 = vadd.f32 %v3748_v46, %v3439_v21 }
 0x26b   : > { %v3067_v15 = vpop.f32.mrf.mxu1 }
 0x26c   : > { %v3068_v49 = vadd.f32 %v3439_v21, %v3067_v15 }
 0x26d   : > { %v3751_v5 = vpop.f32.mrf.mxu1 }
 0x26e   : > { %3100 = vxpose.xlu0.b32.cont [6/16] (narrow) %v3052_v51, 16  ;;  %v3089_v63 = vadd.f32 %v3751_v5, %v3439_v21 }
 0x26f   : > { %v3080_v36 = vpop.f32.mrf.mxu1 }
 0x270   : > { %v3081_v43 = vadd.f32 %v3439_v21, %v3080_v36 }
 0x271   : > { %v3752_v23 = vpop.f32.mrf.mxu1 }
 0x272   : > { %3101 = vxpose.xlu0.b32.cont [7/16] (narrow) %v3057_v16, 16  ;;  %v3092_v52 = vadd.f32 %v3752_v23, %v3439_v21 }
 0x273   : > { %v3083_v37 = vpop.f32.mrf.mxu1 }
 0x274   : > { %v3084_v45 = vadd.f32 %v3439_v21, %v3083_v37 }
 0x276   : > { %3102 = vxpose.xlu0.b32.cont [8/16] (narrow) %v3060_v14, 16 }
 0x27a   : > { %3103 = vxpose.xlu0.b32.cont [9/16] (narrow) %v3065_v17, 16 }
 0x27e   : > { %3104 = vxpose.xlu0.b32.cont [10/16] (narrow) %v3068_v49, 16 }
 0x282   : > { %3105 = vxpose.xlu0.b32.cont [11/16] (narrow) %v3073_v19, 16 }
 0x286   : > { %3106 = vxpose.xlu0.b32.cont [12/16] (narrow) %v3076_v10, 16 }
 0x28a   : > { %3107 = vxpose.xlu0.b32.cont [13/16] (narrow) %v3081_v43, 16 }
 0x28e   : > { %3108 = vxpose.xlu0.b32.cont [14/16] (narrow) %v3084_v45, 16 }
 0x292   : > { %3109 = vxpose.xlu0.b32.cont [15/16] (narrow) %v3089_v63, 16 }
 0x296   : > { %3110 = vxpose.xlu0.b32.end [16/16] (narrow) %v3092_v52, 16 }
 0x2d6   : > { %v3111_v44 = vpop.trf.xlu0 }
 0x2d7   : > { %3127 = vst [vmem:[%s324_s17] sm:$0xff] %v3111_v44 }
 0x2da   : > { %v3112_v26 = vpop.trf.xlu0 }
 0x2db   : > { %3128 = vst [vmem:[%s324_s17 + $0x8] sm:$0xff] %v3112_v26 }
 0x2dc   : > { %3885 = shalt.err (!%p3882_p9)
}
 0x2dd   : > { %s3886_s13 = scalar_lea.hbm %s5103_s18, 256  ;;  %s3890_s19 = scalar_lea.hbm %s5162_s6, 1024 }
 0x2de   : > { %p3887_p10 = scmp.ne.s32.totalorder %s5103_s18, %s3886_s13  ;;  %p3891_p13 = scmp.lt.s32.totalorder %s5103_s18, %s5162_s6 }
 0x2df   : > { %p3892_p0 = scmp.lt.s32.totalorder %s3890_s19, %s3886_s13 }
 0x2e0   : > { %p3888_p11 = pnand %p3887_p10, %p4056_p3 }
 0x2e1   : > { %p3893_p1 = por %p3892_p0, %p3891_p13 }
 0x2e2   : > { %p3889_p12 = pneg %p3888_p11 }
 0x2e4   : > { %p3894_p2 = pnand %p3893_p1, %p3889_p12 }
 0x2e6   : > { %3897 = shalt.err (!%p3894_p2)
}
 0x2e7   : > { %s3967_s24 = smov 128   ;;  %s3968_s12 = smov 256  }
 0x2e8   : > { %s3969_s14 = smov 8  }
 0x2e9   : > { %3765 = dma.vmem_to_hbm [thread:$0]  (%p4056_p3), %s5098_s20, 256, %s5103_s18, %s5105_s25, %s3967_s24, %s3968_s12, %s3969_s14  }
 0x2ea PF: > { %p3771_p4 = scmp.ge.s32.totalorder %s3964_s28, 2  ;;  %s3159_s16 = sand.u32 1, %s3936_s21  }
 0x2eb   : > { %s3160_s13 = scalar_lea.sflag [#allocation4], %s3159_s16 }
 0x2ec   : > { %p3768_p5 = pnand %p3771_p4, %p4065_p8 }
 0x2ee   : > { %p3769_p6 = pneg %p3768_p5 }
 0x2f0   : > { %3931 = dma.done.wait (%p3769_p6), %s3160_s13, 256  }
 0x2f1   : > { %3933 = vsyncadd (%p3769_p6), %s3160_s13, 4294967040  ;;  %s19_s28 = sadd.s32 1, %s3964_s28   ;;  %s5224_s21 = smov %s3940_s22 }
 0x2f2   : > { %p16_p7 = scmp.ge.s32.totalorder %s19_s28, 6   ;;  %s5225_s22 = smov %s3944_s23 }
 0x2f3   : > { %s5226_s23 = smov %s4074_s15  ;;  %s5227_s24 = smov %s3956_s26 }
 0x2f4   : > { %s5228_s25 = smov %s3960_s27  ;;  %s5229_s26 = smov %s5232_s7 }
 0x2f5   : > { %s5230_s27 = smov %s5236_s8  ;;  %18 = sbr.rel (!%p16_p7) target bundleno = 5 (0x5), region = 93 }
 0x2fa   :  { %3165 = vsyncpa [#allocation4], 1 }
 0x2fb   :  { %3167 = vsyncpa [#allocation4 + $0x1], 1 }

</bundles_post_ra>
